<compile_context>
chip_gen: v7x
topology: tpu7x:2x2x1
jax: 0.10.0
libtpu: 0.0.40
codegen_flags: <defaults>
</compile_context>

<pallas_src>
import functools
import math

import jax
import jax.numpy as jnp
from jax.experimental import pallas as pl
from jax.experimental.pallas import tpu as pltpu


# Load-bearing on v5e (default scoped VMEM is 16 MiB).  At realistic sizes raise to
# 64-96 MiB on v6e (128 MiB physical) and keep <= ~48 MiB on v7x (64 MiB physical).
_VMEM_LIMIT = 32 * 1024 * 1024


def _round_up(x, m):
    return -(-x // m) * m


def _cparams(dim_sem):
    return pltpu.CompilerParams(dimension_semantics=dim_sem,
                                vmem_limit_bytes=_VMEM_LIMIT)


# ------------------------------ kernel helpers ------------------------------ #

def _layer_norm(x, g, b, eps):
    mean = jnp.mean(x, axis=-1, keepdims=True)
    var = jnp.mean((x - mean) ** 2, axis=-1, keepdims=True)
    return (x - mean) * jax.lax.rsqrt(var + eps) * g + b


def _attn_head_partial(xq_h_ref, xkv_h_ref, keep_ref, wq_ref, wkv_ref, wo_ref,
                       *, causal, scale):
    """One head's contribution (current grid step) to fc_out(concat(heads)):
       per-head q projection + fused k|v projection, masked softmax attention,
       fold through this head's [hd, E] slice of fc_out.  Returns [Lq, E] f32."""
    xqh = xq_h_ref[0, 0].astype(jnp.bfloat16)            # [Lq, hd]
    xkvh = xkv_h_ref[0, 0].astype(jnp.bfloat16)          # [Lk, hd]
    hd = xqh.shape[1]

    q = jnp.dot(xqh, wq_ref[...], preferred_element_type=jnp.float32)     # [Lq, hd]
    kv = jnp.dot(xkvh, wkv_ref[...], preferred_element_type=jnp.float32)  # [Lk, 2*hd]
    k = kv[:, :hd]
    v = kv[:, hd:]

    # energy = q @ k^T (contract last dims -- no explicit transpose)
    energy = jax.lax.dot_general(q.astype(jnp.bfloat16), k.astype(jnp.bfloat16),
                                 (((1,), (1,)), ((), ())),
                                 preferred_element_type=jnp.float32)      # [Lq, Lk]
    lq, lk = energy.shape

    keep = keep_ref[0] > 0.0                                              # [1, Lk]
    if causal:
        rows = jax.lax.broadcasted_iota(jnp.int32, (lq, lk), 0)
        cols = jax.lax.broadcasted_iota(jnp.int32, (lq, lk), 1)
        keep = jnp.logical_and(keep, rows >= cols)                        # [Lq, Lk]
    energy = jnp.where(keep, energy, jnp.float32(-1e20))    # masked_fill(mask == 0)

    att = energy * scale                                     # / sqrt(embed_size)
    att = att - jnp.max(att, axis=-1, keepdims=True)
    p = jnp.exp(att)
    p = p * pl.reciprocal(jnp.sum(p, axis=-1, keepdims=True), approx=True)   # EUP

    ctx = jnp.dot(p.astype(jnp.bfloat16), v.astype(jnp.bfloat16),
                  preferred_element_type=jnp.float32)                     # [Lq, hd]
    # concat-over-heads @ fc_out  ==  sum_h ctx_h @ wo[h]
    return jnp.dot(ctx.astype(jnp.bfloat16), wo_ref[0],
                   preferred_element_type=jnp.float32)                    # [Lq, E]


# ------------------------------ Pallas kernels ------------------------------ #

def attn_kernel(xq_full_ref, xq_h_ref, xkv_h_ref, keep_ref, wq_ref, wkv_ref, wo_ref,
                bo_ref, g_ref, b_ref, o_ref, acc_ref, *, causal, scale, eps):
    """Attention sublayer only (decoder masked self-attention):
       LayerNorm(SelfAttention(x, x, x, causal_mask) + x). Grid = (batch, heads)."""
    h = pl.program_id(1)

    @pl.when(h == 0)
    def _():
        acc_ref[...] = jnp.zeros_like(acc_ref)

    acc_ref[...] += _attn_head_partial(xq_h_ref, xkv_h_ref, keep_ref,
                                       wq_ref, wkv_ref, wo_ref,
                                       causal=causal, scale=scale)

    @pl.when(h == pl.num_programs(1) - 1)
    def _():
        x = acc_ref[...] + bo_ref[...] + xq_full_ref[0]      # fc_out bias + residual
        o_ref[0] = _layer_norm(x, g_ref[...], b_ref[...], eps)


def attn_ffn_kernel(xq_full_ref, xq_h_ref, xkv_h_ref, keep_ref, wq_ref, wkv_ref,
                    wo_ref, bo_ref, g1_ref, b1_ref, w1_ref, fb1_ref, w2_ref, fb2_ref,
                    g2_ref, b2_ref, o_ref, acc_ref, *, causal, scale, eps):
    """Full TransformerBlock fused in one kernel:
       y = LayerNorm1(Attention(kv, kv, q, mask) + q)
       o = LayerNorm2(FFN(y) + y)
       The [Lq, E] activation and the 4x-wide FFN hidden stay in VMEM/vregs."""
    h = pl.program_id(1)

    @pl.when(h == 0)
    def _():
        acc_ref[...] = jnp.zeros_like(acc_ref)

    acc_ref[...] += _attn_head_partial(xq_h_ref, xkv_h_ref, keep_ref,
                                       wq_ref, wkv_ref, wo_ref,
                                       causal=causal, scale=scale)

    @pl.when(h == pl.num_programs(1) - 1)
    def _():
        xq = xq_full_ref[0]
        attn_out = acc_ref[...] + bo_ref[...] + xq                     # bias + residual
        y = _layer_norm(attn_out, g1_ref[...], b1_ref[...], eps)       # norm1
        hid = jnp.dot(y.astype(jnp.bfloat16), w1_ref[...],
                      preferred_element_type=jnp.float32) + fb1_ref[...]
        hid = jnp.maximum(hid, 0.0)                                    # ReLU
        ff = jnp.dot(hid.astype(jnp.bfloat16), w2_ref[...],
                     preferred_element_type=jnp.float32) + fb2_ref[...]
        o_ref[0] = _layer_norm(ff + y, g2_ref[...], b2_ref[...], eps)  # norm2 + residual


def head_softmax_kernel(x_ref, w_ref, b_ref, o_ref):
    """Decoder fc_out (E -> vocab) fused with the final Softmax(dim=-1).
       Exact division keeps row sums ~1.0 (approx reciprocal is a v6e/v7x-only
       micro-win once VALU-bound at real vocab)."""
    logits = jnp.dot(x_ref[...].astype(jnp.bfloat16), w_ref[...],
                     preferred_element_type=jnp.float32) + b_ref[...]   # [tm, V]
    m = jnp.max(logits, axis=-1, keepdims=True)
    e = jnp.exp(logits - m)
    o_ref[...] = e / jnp.sum(e, axis=-1, keepdims=True)
    # TODO(synk): tile the vocab axis (two-pass / online softmax) at realistic V so the
    #             [E, V] weight is not resident double-buffered (v7x 64 MiB VMEM).


# ------------------------------ kernel wrappers ------------------------------ #

def _split_heads(x, heads):
    n, length, e = x.shape
    hd = e // heads
    return x.reshape(n, length, heads, hd).transpose(0, 2, 1, 3)   # [N, H, L, hd]


def attn_sublayer(p, x_q, x_kv, keep, heads, causal):
    """LayerNorm(SelfAttention(value=x_kv, key=x_kv, query=x_q, mask) + x_q)."""
    n, lq, e = x_q.shape
    lk = x_kv.shape[1]
    hd = e // heads
    xq_h = _split_heads(x_q, heads)
    xkv_h = _split_heads(x_kv, heads)
    kern = functools.partial(attn_kernel, causal=causal,
                             scale=1.0 / math.sqrt(e), eps=1e-5)
    vspec = pl.BlockSpec((1, e), lambda b, h: (0, 0))
    return pl.pallas_call(
        kern,
        grid=(n, heads),
        in_specs=[
            pl.BlockSpec((1, lq, e), lambda b, h: (b, 0, 0)),        # full query (residual)
            pl.BlockSpec((1, 1, lq, hd), lambda b, h: (b, h, 0, 0)),  # per-head query
            pl.BlockSpec((1, 1, lk, hd), lambda b, h: (b, h, 0, 0)),  # per-head key/value src
            pl.BlockSpec((1, 1, lk), lambda b, h: (b, 0, 0)),         # key-keep vector
            pl.BlockSpec((hd, hd), lambda b, h: (0, 0)),              # wq
            pl.BlockSpec((hd, 2 * hd), lambda b, h: (0, 0)),          # wk|wv fused
            pl.BlockSpec((1, hd, e), lambda b, h: (h, 0, 0)),         # fc_out, split per head
            vspec, vspec, vspec,                                      # bo, ln_g, ln_b
        ],
        out_specs=pl.BlockSpec((1, lq, e), lambda b, h: (b, 0, 0)),
        out_shape=jax.ShapeDtypeStruct((n, lq, e), jnp.float32),
        scratch_shapes=[pltpu.VMEM((lq, e), jnp.float32)],
        compiler_params=_cparams(("parallel", "arbitrary")),
    )(x_q, xq_h, xkv_h, keep, p["wq"], p["wkv"], p["wo"], p["bo"],
      p["ln_g"], p["ln_b"])


def attn_ffn_sublayer(p, x_q, x_kv, keep, heads, causal):
    """One fused TransformerBlock: attention + norm1 + FFN + norm2."""
    n, lq, e = x_q.shape
    lk = x_kv.shape[1]
    hd = e // heads
    hidden = p["w1"].shape[1]
    xq_h = _split_heads(x_q, heads)
    xkv_h = _split_heads(x_kv, heads)
    kern = functools.partial(attn_ffn_kernel, causal=causal,
                             scale=1.0 / math.sqrt(e), eps=1e-5)
    vspec = pl.BlockSpec((1, e), lambda b, h: (0, 0))
    return pl.pallas_call(
        kern,
        grid=(n, heads),
        in_specs=[
            pl.BlockSpec((1, lq, e), lambda b, h: (b, 0, 0)),
            pl.BlockSpec((1, 1, lq, hd), lambda b, h: (b, h, 0, 0)),
            pl.BlockSpec((1, 1, lk, hd), lambda b, h: (b, h, 0, 0)),
            pl.BlockSpec((1, 1, lk), lambda b, h: (b, 0, 0)),
            pl.BlockSpec((hd, hd), lambda b, h: (0, 0)),
            pl.BlockSpec((hd, 2 * hd), lambda b, h: (0, 0)),
            pl.BlockSpec((1, hd, e), lambda b, h: (h, 0, 0)),
            vspec, vspec, vspec,                                      # bo, ln1_g, ln1_b
            pl.BlockSpec((e, hidden), lambda b, h: (0, 0)),           # w1
            pl.BlockSpec((1, hidden), lambda b, h: (0, 0)),           # b1
            pl.BlockSpec((hidden, e), lambda b, h: (0, 0)),           # w2
            vspec, vspec, vspec,                                      # b2, ln2_g, ln2_b
        ],
        out_specs=pl.BlockSpec((1, lq, e), lambda b, h: (b, 0, 0)),
        out_shape=jax.ShapeDtypeStruct((n, lq, e), jnp.float32),
        scratch_shapes=[pltpu.VMEM((lq, e), jnp.float32)],
        compiler_params=_cparams(("parallel", "arbitrary")),
    )(x_q, xq_h, xkv_h, keep, p["wq"], p["wkv"], p["wo"], p["bo"],
      p["ln_g"], p["ln_b"], p["w1"], p["fb1"], p["w2"], p["fb2"],
      p["ln2_g"], p["ln2_b"])


def head_softmax(x3d, w, b):
    n, length, e = x3d.shape
    v = w.shape[1]
    rows = n * length
    tm = min(1024, _round_up(rows, 8))       # 8-multiple row tiles (f32 sublane)
    padded = _round_up(rows, tm)
    x2 = x3d.reshape(rows, e)
    if padded != rows:
        x2 = jnp.pad(x2, ((0, padded - rows), (0, 0)))
    out = pl.pallas_call(
        head_softmax_kernel,
        grid=(padded // tm,),
        in_specs=[
            pl.BlockSpec((tm, e), lambda i: (i, 0)),
            pl.BlockSpec((e, v), lambda i: (0, 0)),
            pl.BlockSpec((1, v), lambda i: (0, 0)),
        ],
        out_specs=pl.BlockSpec((tm, v), lambda i: (i, 0)),
        out_shape=jax.ShapeDtypeStruct((padded, v), jnp.float32),
        compiler_params=_cparams(("parallel",)),
    )(x2, w, b)
    return out[:rows].reshape(n, length, v)


# -------------------------------- model blocks ------------------------------- #

def transformer_fwd(params, src, tgt, src_pad_idx, heads):
    n, ls = src.shape
    _, lt = tgt.shape
    # O(N*L) key-keep vectors instead of dense O(N*L^2) masks.
    src_keep = (src != src_pad_idx).astype(jnp.float32).reshape(n, 1, ls)
    ones_keep = jnp.ones((n, 1, lt), jnp.float32)   # decoder self-attn: causal only

    # Encoder: embeddings + N fused TransformerBlocks (self-attn + FFN in one call).
    enc = params["encoder"]
    x = enc["word_emb"][src] + enc["pos_emb"][:ls][None, :, :]
    for lp in enc["layers"]:
        x = attn_ffn_sublayer(lp, x, x, src_keep, heads, causal=False)
    enc_out = x

    # Decoder: masked self-attn (+norm), then fused cross-attn TransformerBlock.
    dec = params["decoder"]
    y = dec["word_emb"][tgt] + dec["pos_emb"][:lt][None, :, :]
    for lp in dec["layers"]:
        q = attn_sublayer(lp["self_attn"], y, y, ones_keep, heads, causal=True)
        y = attn_ffn_sublayer(lp["block"], q, enc_out, src_keep, heads, causal=False)

    # Decoder fc_out fused with the Transformer's final Softmax(dim=-1).
    return head_softmax(y, dec["fc_w"], dec["fc_b"])


# ------------------------------- parameter init ------------------------------ #

class KeyGen:
    def __init__(self, key):
        self.key = key

    def __call__(self):
        self.key, sub = jax.random.split(self.key)
        return sub


def _attn_params(kg, e, heads):
    hd = e // heads

    def w(m, nn_):
        return jax.random.normal(kg(), (m, nn_), jnp.float32) * 0.02

    wk, wv = w(hd, hd), w(hd, hd)
    return {
        # Single nn.Linear(head_dim, head_dim, bias=False) shared across all heads:
        # true [hd, hd] matmul per head (no block-diagonal zero FLOPs); K|V fused.
        "wq": w(hd, hd).astype(jnp.bfloat16),
        "wkv": jnp.concatenate([wk, wv], axis=1).astype(jnp.bfloat16),      # [hd, 2hd]
        # fc_out Linear(E, E), pre-split per head -> [H, hd, E] (clean DMA slices).
        "wo": w(e, e).reshape(heads, hd, e).astype(jnp.bfloat16),
        "bo": jnp.zeros((1, e), jnp.float32),
        "ln_g": jnp.ones((1, e), jnp.float32),
        "ln_b": jnp.zeros((1, e), jnp.float32),
    }


def _ffn_params(kg, e, fe):
    return {
        "w1": (jax.random.normal(kg(), (e, fe * e), jnp.float32) * 0.02).astype(jnp.bfloat16),
        "fb1": jnp.zeros((1, fe * e), jnp.float32),
        "w2": (jax.random.normal(kg(), (fe * e, e), jnp.float32) * 0.02).astype(jnp.bfloat16),
        "fb2": jnp.zeros((1, e), jnp.float32),
        "ln2_g": jnp.ones((1, e), jnp.float32),
        "ln2_b": jnp.zeros((1, e), jnp.float32),
    }


def _block_params(kg, e, heads, fe):
    p = _attn_params(kg, e, heads)     # ln_g / ln_b act as norm1
    p.update(_ffn_params(kg, e, fe))
    return p


def init_params(key, src_vocab, tgt_vocab, e, heads, n_layers, max_len, fe):
    kg = KeyGen(key)
    enc = {
        "word_emb": jax.random.normal(kg(), (src_vocab, e), jnp.float32) * 0.02,
        "pos_emb": jax.random.normal(kg(), (max_len, e), jnp.float32) * 0.02,
        "layers": [_block_params(kg, e, heads, fe) for _ in range(n_layers)],
    }
    dec = {
        "word_emb": jax.random.normal(kg(), (tgt_vocab, e), jnp.float32) * 0.02,
        "pos_emb": jax.random.normal(kg(), (max_len, e), jnp.float32) * 0.02,
        "layers": [{"self_attn": _attn_params(kg, e, heads),
                    "block": _block_params(kg, e, heads, fe)}
                   for _ in range(n_layers)],
        "fc_w": (jax.random.normal(kg(), (e, tgt_vocab), jnp.float32) * 0.02).astype(jnp.bfloat16),
        "fc_b": jnp.zeros((1, tgt_vocab), jnp.float32),
    }
    return {"encoder": enc, "decoder": dec}


# ------------------------------------ main ----------------------------------- #

if __name__ == "__main__":
    # small config consistent with the module constructor
    SRC_VOCAB, TGT_VOCAB = 50, 60
    SRC_PAD = 0
    EMBED, HEADS, N_LAYERS, MAX_LEN, FWD_EXP = 32, 4, 2, 16, 4
    N, LS, LT = 2, 12, 8

    root = jax.random.PRNGKey(0)
    k_param, k_src, k_tgt = jax.random.split(root, 3)
    params = init_params(k_param, SRC_VOCAB, TGT_VOCAB, EMBED, HEADS, N_LAYERS,
                         MAX_LEN, FWD_EXP)

    src = jax.random.randint(k_src, (N, LS), 1, SRC_VOCAB, dtype=jnp.int32)
    src = src.at[0, -3:].set(SRC_PAD)          # some padding to exercise the src mask
    tgt = jax.random.randint(k_tgt, (N, LT), 1, TGT_VOCAB, dtype=jnp.int32)

    fwd = jax.jit(functools.partial(transformer_fwd, src_pad_idx=SRC_PAD, heads=HEADS))
    probs = fwd(params, src, tgt)
    jax.block_until_ready(probs)

    assert probs.shape == (N, LT, TGT_VOCAB)
    assert bool(jnp.all(jnp.isfinite(probs)))
    assert bool(jnp.allclose(jnp.sum(probs, axis=-1), 1.0, atol=1e-4))
    print("KERNEL_OK")
</pallas_src>

<mosaic_0001>
module attributes {stable_mosaic.version = 11 : i64} {
  func.func @attn_ffn_kernel(%arg0: i32, %arg1: i32, %arg2: memref<1x12x32xf32, #tpu.memory_space<vmem>>, %arg3: memref<1x1x12x8xf32, #tpu.memory_space<vmem>>, %arg4: memref<1x1x12x8xf32, #tpu.memory_space<vmem>>, %arg5: memref<1x1x12xf32, #tpu.memory_space<vmem>>, %arg6: memref<8x8xbf16, #tpu.memory_space<vmem>>, %arg7: memref<8x16xbf16, #tpu.memory_space<vmem>>, %arg8: memref<1x8x32xbf16, #tpu.memory_space<vmem>>, %arg9: memref<1x32xf32, #tpu.memory_space<vmem>>, %arg10: memref<1x32xf32, #tpu.memory_space<vmem>>, %arg11: memref<1x32xf32, #tpu.memory_space<vmem>>, %arg12: memref<32x128xbf16, #tpu.memory_space<vmem>>, %arg13: memref<1x128xf32, #tpu.memory_space<vmem>>, %arg14: memref<128x32xbf16, #tpu.memory_space<vmem>>, %arg15: memref<1x32xf32, #tpu.memory_space<vmem>>, %arg16: memref<1x32xf32, #tpu.memory_space<vmem>>, %arg17: memref<1x32xf32, #tpu.memory_space<vmem>>, %arg18: memref<1x12x32xf32, #tpu.memory_space<vmem>>, %arg19: memref<12x32xf32, #tpu.memory_space<vmem>>) attributes {dimension_semantics = [#tpu.dimension_semantics<parallel>, #tpu.dimension_semantics<arbitrary>], iteration_bounds = array<i64: 2, 4>, scalar_prefetch = 0 : i64, scratch_operands = 1 : i64, tpu.core_type = #tpu.core_type<tc>, window_params = [{transform_indices = @transform_0, window_bounds = array<i64: 1, 12, 32>}, {transform_indices = @transform_1, window_bounds = array<i64: 1, 1, 12, 8>}, {transform_indices = @transform_2, window_bounds = array<i64: 1, 1, 12, 8>}, {transform_indices = @transform_3, window_bounds = array<i64: 1, 1, 12>}, {pipeline_mode = #tpu.pipeline_mode<synchronous>, transform_indices = @transform_4, window_bounds = array<i64: 8, 8>}, {pipeline_mode = #tpu.pipeline_mode<synchronous>, transform_indices = @transform_5, window_bounds = array<i64: 8, 16>}, {transform_indices = @transform_6, window_bounds = array<i64: 1, 8, 32>}, {pipeline_mode = #tpu.pipeline_mode<synchronous>, transform_indices = @transform_7, window_bounds = array<i64: 1, 32>}, {pipeline_mode = #tpu.pipeline_mode<synchronous>, transform_indices = @transform_8, window_bounds = array<i64: 1, 32>}, {pipeline_mode = #tpu.pipeline_mode<synchronous>, transform_indices = @transform_9, window_bounds = array<i64: 1, 32>}, {pipeline_mode = #tpu.pipeline_mode<synchronous>, transform_indices = @transform_10, window_bounds = array<i64: 32, 128>}, {pipeline_mode = #tpu.pipeline_mode<synchronous>, transform_indices = @transform_11, window_bounds = array<i64: 1, 128>}, {pipeline_mode = #tpu.pipeline_mode<synchronous>, transform_indices = @transform_12, window_bounds = array<i64: 128, 32>}, {pipeline_mode = #tpu.pipeline_mode<synchronous>, transform_indices = @transform_13, window_bounds = array<i64: 1, 32>}, {pipeline_mode = #tpu.pipeline_mode<synchronous>, transform_indices = @transform_14, window_bounds = array<i64: 1, 32>}, {pipeline_mode = #tpu.pipeline_mode<synchronous>, transform_indices = @transform_15, window_bounds = array<i64: 1, 32>}, {transform_indices = @transform_16, window_bounds = array<i64: 1, 12, 32>}]} {
    %c0_i32 = arith.constant 0 : i32
    %0 = arith.cmpi eq, %arg1, %c0_i32 : i32
    %1 = arith.extui %0 : i1 to i32
    %c0_i32_0 = arith.constant 0 : i32
    %2 = arith.cmpi ne, %1, %c0_i32_0 : i32
    scf.if %2 {
      %cst_32 = arith.constant 0.000000e+00 : f32
      %51 = vector.broadcast %cst_32 : f32 to vector<12x32xf32>
      %c0_33 = arith.constant 0 : index
      %c0_34 = arith.constant 0 : index
      %52 = vector.load %arg19[%c0_33, %c0_34] : memref<12x32xf32, #tpu.memory_space<vmem>>, vector<12x32xf32>
      tpu.vector_store %arg19[%c0_33, %c0_34], %51 {strides = array<i32>} : memref<12x32xf32, #tpu.memory_space<vmem>>, vector<12x32xf32>,
    } else {
    }
    %c0 = arith.constant 0 : index
    %c0_1 = arith.constant 0 : index
    %3 = vector.load %arg19[%c0, %c0_1] : memref<12x32xf32, #tpu.memory_space<vmem>>, vector<12x32xf32>
    %c0_2 = arith.constant 0 : index
    %c0_3 = arith.constant 0 : index
    %c0_4 = arith.constant 0 : index
    %c0_5 = arith.constant 0 : index
    %4 = vector.load %arg3[%c0_2, %c0_3, %c0_4, %c0_5] : memref<1x1x12x8xf32, #tpu.memory_space<vmem>>, vector<1x1x12x8xf32>
    %5 = vector.shape_cast %4 : vector<1x1x12x8xf32> to vector<12x8xf32>
    %6 = arith.truncf %5 : vector<12x8xf32> to vector<12x8xbf16>
    %c0_6 = arith.constant 0 : index
    %c0_7 = arith.constant 0 : index
    %c0_8 = arith.constant 0 : index
    %c0_9 = arith.constant 0 : index
    %7 = vector.load %arg4[%c0_6, %c0_7, %c0_8, %c0_9] : memref<1x1x12x8xf32, #tpu.memory_space<vmem>>, vector<1x1x12x8xf32>
    %8 = vector.shape_cast %7 : vector<1x1x12x8xf32> to vector<12x8xf32>
    %9 = arith.truncf %8 : vector<12x8xf32> to vector<12x8xbf16>
    %c0_10 = arith.constant 0 : index
    %c0_11 = arith.constant 0 : index
    %10 = vector.load %arg6[%c0_10, %c0_11] : memref<8x8xbf16, #tpu.memory_space<vmem>>, vector<8x8xbf16>
    %cst = arith.constant dense<0.000000e+00> : vector<12x8xf32>
    %11 = tpu.matmul %6, %10, %cst {dimension_numbers = #tpu.dot_dimension_numbers<[1], [0], [0], [1], [0, 0, 1, 1], [], []>} : vector<12x8xbf16>, vector<8x8xbf16>, vector<12x8xf32> -> vector<12x8xf32>
    %c0_12 = arith.constant 0 : index
    %c0_13 = arith.constant 0 : index
    %12 = vector.load %arg7[%c0_12, %c0_13] : memref<8x16xbf16, #tpu.memory_space<vmem>>, vector<8x16xbf16>
    %cst_14 = arith.constant dense<0.000000e+00> : vector<12x16xf32>
    %13 = tpu.matmul %9, %12, %cst_14 {dimension_numbers = #tpu.dot_dimension_numbers<[1], [0], [0], [1], [0, 0, 1, 1], [], []>} : vector<12x8xbf16>, vector<8x16xbf16>, vector<12x16xf32> -> vector<12x16xf32>
    %14 = vector.extract_strided_slice %13 {offsets = [0, 0], sizes = [12, 8], strides = [1, 1]} : vector<12x16xf32> to vector<12x8xf32>
    %15 = vector.extract_strided_slice %13 {offsets = [0, 8], sizes = [12, 8], strides = [1, 1]} : vector<12x16xf32> to vector<12x8xf32>
    %16 = arith.truncf %11 : vector<12x8xf32> to vector<12x8xbf16>
    %17 = arith.truncf %14 : vector<12x8xf32> to vector<12x8xbf16>
    %cst_15 = arith.constant dense<0.000000e+00> : vector<12x12xf32>
    %18 = tpu.matmul %16, %17, %cst_15 {dimension_numbers = #tpu.dot_dimension_numbers<[1], [1], [0], [0], [0, 0, 1, 0], [], []>} : vector<12x8xbf16>, vector<12x8xbf16>, vector<12x12xf32> -> vector<12x12xf32>
    %c0_16 = arith.constant 0 : index
    %c0_17 = arith.constant 0 : index
    %c0_18 = arith.constant 0 : index
    %19 = vector.load %arg5[%c0_16, %c0_17, %c0_18] : memref<1x1x12xf32, #tpu.memory_space<vmem>>, vector<1x1x12xf32>
    %20 = vector.shape_cast %19 : vector<1x1x12xf32> to vector<1x12xf32>
    %cst_19 = arith.constant 0.000000e+00 : f32
    %21 = vector.broadcast %cst_19 : f32 to vector<1x12xf32>
    %22 = arith.cmpf ogt, %20, %21 : vector<1x12xf32>
    %cst_20 = arith.constant -1.000000e+20 : f32
    %23 = vector.shape_cast %22 : vector<1x12xi1> to vector<1x12xi1>
    %24 = vector.broadcast %23 : vector<1x12xi1> to vector<12x12xi1>
    %25 = vector.broadcast %cst_20 : f32 to vector<12x12xf32>
    %26 = arith.select %24, %18, %25 : vector<12x12xi1>, vector<12x12xf32>
    %cst_21 = arith.constant 0.176776692 : f32
    %27 = vector.broadcast %cst_21 : f32 to vector<12x12xf32>
    %28 = arith.mulf %26, %27 : vector<12x12xf32>
    %cst_22 = arith.constant dense<0xFF800000> : vector<12xf32>
    %29 = vector.multi_reduction <maximumf>, %28, %cst_22 [1] : vector<12x12xf32> to vector<12xf32>
    %30 = vector.shape_cast %29 : vector<12xf32> to vector<12x1xf32>
    %31 = vector.broadcast %30 : vector<12x1xf32> to vector<12x12xf32>
    %32 = arith.subf %28, %31 : vector<12x12xf32>
    %33 = math.exp %32 : vector<12x12xf32>
    %cst_23 = arith.constant dense<0.000000e+00> : vector<12xf32>
    %34 = vector.multi_reduction <add>, %33, %cst_23 [1] : vector<12x12xf32> to vector<12xf32>
    %35 = vector.shape_cast %34 : vector<12xf32> to vector<12x1xf32>
    %36 = tpu.reciprocal %35 {approx = true} : vector<12x1xf32> -> vector<12x1xf32>
    %37 = vector.broadcast %36 : vector<12x1xf32> to vector<12x12xf32>
    %38 = arith.mulf %33, %37 : vector<12x12xf32>
    %39 = arith.truncf %38 : vector<12x12xf32> to vector<12x12xbf16>
    %40 = arith.truncf %15 : vector<12x8xf32> to vector<12x8xbf16>
    %cst_24 = arith.constant dense<0.000000e+00> : vector<12x8xf32>
    %41 = tpu.matmul %39, %40, %cst_24 {dimension_numbers = #tpu.dot_dimension_numbers<[1], [0], [0], [1], [0, 0, 1, 1], [], []>} : vector<12x12xbf16>, vector<12x8xbf16>, vector<12x8xf32> -> vector<12x8xf32>
    %42 = arith.truncf %41 : vector<12x8xf32> to vector<12x8xbf16>
    %c0_25 = arith.constant 0 : index
    %c0_26 = arith.constant 0 : index
    %c0_27 = arith.constant 0 : index
    %43 = vector.load %arg8[%c0_25, %c0_26, %c0_27] : memref<1x8x32xbf16, #tpu.memory_space<vmem>>, vector<1x8x32xbf16>
    %44 = vector.shape_cast %43 : vector<1x8x32xbf16> to vector<8x32xbf16>
    %cst_28 = arith.constant dense<0.000000e+00> : vector<12x32xf32>
    %45 = tpu.matmul %42, %44, %cst_28 {dimension_numbers = #tpu.dot_dimension_numbers<[1], [0], [0], [1], [0, 0, 1, 1], [], []>} : vector<12x8xbf16>, vector<8x32xbf16>, vector<12x32xf32> -> vector<12x32xf32>
    %46 = arith.addf %3, %45 : vector<12x32xf32>
    %c0_29 = arith.constant 0 : index
    %c0_30 = arith.constant 0 : index
    %47 = vector.load %arg19[%c0_29, %c0_30] : memref<12x32xf32, #tpu.memory_space<vmem>>, vector<12x32xf32>
    tpu.vector_store %arg19[%c0_29, %c0_30], %46 {strides = array<i32>} : memref<12x32xf32, #tpu.memory_space<vmem>>, vector<12x32xf32>,
    %c3_i32 = arith.constant 3 : i32
    %48 = arith.cmpi eq, %arg1, %c3_i32 : i32
    %49 = arith.extui %48 : i1 to i32
    %c0_i32_31 = arith.constant 0 : i32
    %50 = arith.cmpi ne, %49, %c0_i32_31 : i32
    scf.if %50 {
      %c0_32 = arith.constant 0 : index
      %c0_33 = arith.constant 0 : index
      %c0_34 = arith.constant 0 : index
      %51 = vector.load %arg2[%c0_32, %c0_33, %c0_34] : memref<1x12x32xf32, #tpu.memory_space<vmem>>, vector<1x12x32xf32>
      %52 = vector.shape_cast %51 : vector<1x12x32xf32> to vector<12x32xf32>
      %c0_35 = arith.constant 0 : index
      %c0_36 = arith.constant 0 : index
      %53 = vector.load %arg19[%c0_35, %c0_36] : memref<12x32xf32, #tpu.memory_space<vmem>>, vector<12x32xf32>
      %c0_37 = arith.constant 0 : index
      %c0_38 = arith.constant 0 : index
      %54 = vector.load %arg9[%c0_37, %c0_38] : memref<1x32xf32, #tpu.memory_space<vmem>>, vector<1x32xf32>
      %55 = vector.broadcast %54 : vector<1x32xf32> to vector<12x32xf32>
      %56 = arith.addf %53, %55 : vector<12x32xf32>
      %57 = arith.addf %56, %52 : vector<12x32xf32>
      %c0_39 = arith.constant 0 : index
      %c0_40 = arith.constant 0 : index
      %58 = vector.load %arg10[%c0_39, %c0_40] : memref<1x32xf32, #tpu.memory_space<vmem>>, vector<1x32xf32>
      %c0_41 = arith.constant 0 : index
      %c0_42 = arith.constant 0 : index
      %59 = vector.load %arg11[%c0_41, %c0_42] : memref<1x32xf32, #tpu.memory_space<vmem>>, vector<1x32xf32>
      %cst_43 = arith.constant dense<0.000000e+00> : vector<12xf32>
      %60 = vector.multi_reduction <add>, %57, %cst_43 [1] : vector<12x32xf32> to vector<12xf32>
      %61 = vector.shape_cast %60 : vector<12xf32> to vector<12x1xf32>
      %cst_44 = arith.constant 3.200000e+01 : f32
      %62 = vector.broadcast %cst_44 : f32 to vector<12x1xf32>
      %63 = arith.divf %61, %62 : vector<12x1xf32>
      %64 = vector.broadcast %63 : vector<12x1xf32> to vector<12x32xf32>
      %65 = arith.subf %57, %64 : vector<12x32xf32>
      %66 = arith.mulf %65, %65 : vector<12x32xf32>
      %cst_45 = arith.constant dense<0.000000e+00> : vector<12xf32>
      %67 = vector.multi_reduction <add>, %66, %cst_45 [1] : vector<12x32xf32> to vector<12xf32>
      %68 = vector.shape_cast %67 : vector<12xf32> to vector<12x1xf32>
      %cst_46 = arith.constant 3.200000e+01 : f32
      %69 = vector.broadcast %cst_46 : f32 to vector<12x1xf32>
      %70 = arith.divf %68, %69 : vector<12x1xf32>
      %71 = vector.broadcast %63 : vector<12x1xf32> to vector<12x32xf32>
      %72 = arith.subf %57, %71 : vector<12x32xf32>
      %cst_47 = arith.constant 9.99999974E-6 : f32
      %73 = vector.broadcast %cst_47 : f32 to vector<12x1xf32>
      %74 = arith.addf %70, %73 : vector<12x1xf32>
      %75 = math.rsqrt %74 : vector<12x1xf32>
      %76 = vector.broadcast %75 : vector<12x1xf32> to vector<12x32xf32>
      %77 = arith.mulf %72, %76 : vector<12x32xf32>
      %78 = vector.broadcast %58 : vector<1x32xf32> to vector<12x32xf32>
      %79 = arith.mulf %77, %78 : vector<12x32xf32>
      %80 = vector.broadcast %59 : vector<1x32xf32> to vector<12x32xf32>
      %81 = arith.addf %79, %80 : vector<12x32xf32>
      %82 = arith.truncf %81 : vector<12x32xf32> to vector<12x32xbf16>
      %c0_48 = arith.constant 0 : index
      %c0_49 = arith.constant 0 : index
      %83 = vector.load %arg12[%c0_48, %c0_49] : memref<32x128xbf16, #tpu.memory_space<vmem>>, vector<32x128xbf16>
      %cst_50 = arith.constant dense<0.000000e+00> : vector<12x128xf32>
      %84 = tpu.matmul %82, %83, %cst_50 {dimension_numbers = #tpu.dot_dimension_numbers<[1], [0], [0], [1], [0, 0, 1, 1], [], []>} : vector<12x32xbf16>, vector<32x128xbf16>, vector<12x128xf32> -> vector<12x128xf32>
      %c0_51 = arith.constant 0 : index
      %c0_52 = arith.constant 0 : index
      %85 = vector.load %arg13[%c0_51, %c0_52] : memref<1x128xf32, #tpu.memory_space<vmem>>, vector<1x128xf32>
      %86 = vector.broadcast %85 : vector<1x128xf32> to vector<12x128xf32>
      %87 = arith.addf %84, %86 : vector<12x128xf32>
      %cst_53 = arith.constant 0.000000e+00 : f32
      %88 = vector.broadcast %cst_53 : f32 to vector<12x128xf32>
      %89 = arith.maximumf %87, %88 : vector<12x128xf32>
      %90 = arith.truncf %89 : vector<12x128xf32> to vector<12x128xbf16>
      %c0_54 = arith.constant 0 : index
      %c0_55 = arith.constant 0 : index
      %91 = vector.load %arg14[%c0_54, %c0_55] : memref<128x32xbf16, #tpu.memory_space<vmem>>, vector<128x32xbf16>
      %cst_56 = arith.constant dense<0.000000e+00> : vector<12x32xf32>
      %92 = tpu.matmul %90, %91, %cst_56 {dimension_numbers = #tpu.dot_dimension_numbers<[1], [0], [0], [1], [0, 0, 1, 1], [], []>} : vector<12x128xbf16>, vector<128x32xbf16>, vector<12x32xf32> -> vector<12x32xf32>
      %c0_57 = arith.constant 0 : index
      %c0_58 = arith.constant 0 : index
      %93 = vector.load %arg15[%c0_57, %c0_58] : memref<1x32xf32, #tpu.memory_space<vmem>>, vector<1x32xf32>
      %94 = vector.broadcast %93 : vector<1x32xf32> to vector<12x32xf32>
      %95 = arith.addf %92, %94 : vector<12x32xf32>
      %96 = arith.addf %95, %81 : vector<12x32xf32>
      %c0_59 = arith.constant 0 : index
      %c0_60 = arith.constant 0 : index
      %97 = vector.load %arg16[%c0_59, %c0_60] : memref<1x32xf32, #tpu.memory_space<vmem>>, vector<1x32xf32>
      %c0_61 = arith.constant 0 : index
      %c0_62 = arith.constant 0 : index
      %98 = vector.load %arg17[%c0_61, %c0_62] : memref<1x32xf32, #tpu.memory_space<vmem>>, vector<1x32xf32>
      %cst_63 = arith.constant dense<0.000000e+00> : vector<12xf32>
      %99 = vector.multi_reduction <add>, %96, %cst_63 [1] : vector<12x32xf32> to vector<12xf32>
      %100 = vector.shape_cast %99 : vector<12xf32> to vector<12x1xf32>
      %cst_64 = arith.constant 3.200000e+01 : f32
      %101 = vector.broadcast %cst_64 : f32 to vector<12x1xf32>
      %102 = arith.divf %100, %101 : vector<12x1xf32>
      %103 = vector.broadcast %102 : vector<12x1xf32> to vector<12x32xf32>
      %104 = arith.subf %96, %103 : vector<12x32xf32>
      %105 = arith.mulf %104, %104 : vector<12x32xf32>
      %cst_65 = arith.constant dense<0.000000e+00> : vector<12xf32>
      %106 = vector.multi_reduction <add>, %105, %cst_65 [1] : vector<12x32xf32> to vector<12xf32>
      %107 = vector.shape_cast %106 : vector<12xf32> to vector<12x1xf32>
      %cst_66 = arith.constant 3.200000e+01 : f32
      %108 = vector.broadcast %cst_66 : f32 to vector<12x1xf32>
      %109 = arith.divf %107, %108 : vector<12x1xf32>
      %110 = vector.broadcast %102 : vector<12x1xf32> to vector<12x32xf32>
      %111 = arith.subf %96, %110 : vector<12x32xf32>
      %cst_67 = arith.constant 9.99999974E-6 : f32
      %112 = vector.broadcast %cst_67 : f32 to vector<12x1xf32>
      %113 = arith.addf %109, %112 : vector<12x1xf32>
      %114 = math.rsqrt %113 : vector<12x1xf32>
      %115 = vector.broadcast %114 : vector<12x1xf32> to vector<12x32xf32>
      %116 = arith.mulf %111, %115 : vector<12x32xf32>
      %117 = vector.broadcast %97 : vector<1x32xf32> to vector<12x32xf32>
      %118 = arith.mulf %116, %117 : vector<12x32xf32>
      %119 = vector.broadcast %98 : vector<1x32xf32> to vector<12x32xf32>
      %120 = arith.addf %118, %119 : vector<12x32xf32>
      %c0_68 = arith.constant 0 : index
      %c0_69 = arith.constant 0 : index
      %c0_70 = arith.constant 0 : index
      %121 = vector.load %arg18[%c0_68, %c0_69, %c0_70] : memref<1x12x32xf32, #tpu.memory_space<vmem>>, vector<1x12x32xf32>
      %122 = vector.shape_cast %121 : vector<1x12x32xf32> to vector<12x32xf32>
      %123 = vector.shape_cast %120 : vector<12x32xf32> to vector<1x12x32xf32>
      tpu.vector_store %arg18[%c0_68, %c0_69, %c0_70], %123 {strides = array<i32>} : memref<1x12x32xf32, #tpu.memory_space<vmem>>, vector<1x12x32xf32>,
    } else {
    }
    return
  }
  func.func @transform_0(%arg0: i32, %arg1: i32) -> (i32, i32, i32) {
    %c0_i32 = arith.constant 0 : i32
    %c0_i32_0 = arith.constant 0 : i32
    %c0_i32_1 = arith.constant 0 : i32
    return %arg0, %c0_i32, %c0_i32_0 : i32, i32, i32
  }
  func.func @transform_1(%arg0: i32, %arg1: i32) -> (i32, i32, i32, i32) {
    %c0_i32 = arith.constant 0 : i32
    %c0_i32_0 = arith.constant 0 : i32
    %c0_i32_1 = arith.constant 0 : i32
    return %arg0, %arg1, %c0_i32, %c0_i32_0 : i32, i32, i32, i32
  }
  func.func @transform_2(%arg0: i32, %arg1: i32) -> (i32, i32, i32, i32) {
    %c0_i32 = arith.constant 0 : i32
    %c0_i32_0 = arith.constant 0 : i32
    %c0_i32_1 = arith.constant 0 : i32
    return %arg0, %arg1, %c0_i32, %c0_i32_0 : i32, i32, i32, i32
  }
  func.func @transform_3(%arg0: i32, %arg1: i32) -> (i32, i32, i32) {
    %c0_i32 = arith.constant 0 : i32
    %c0_i32_0 = arith.constant 0 : i32
    %c0_i32_1 = arith.constant 0 : i32
    return %arg0, %c0_i32, %c0_i32_0 : i32, i32, i32
  }
  func.func @transform_4(%arg0: i32, %arg1: i32) -> (i32, i32) {
    %c0_i32 = arith.constant 0 : i32
    %c0_i32_0 = arith.constant 0 : i32
    %c0_i32_1 = arith.constant 0 : i32
    return %c0_i32, %c0_i32_0 : i32, i32
  }
  func.func @transform_5(%arg0: i32, %arg1: i32) -> (i32, i32) {
    %c0_i32 = arith.constant 0 : i32
    %c0_i32_0 = arith.constant 0 : i32
    %c0_i32_1 = arith.constant 0 : i32
    return %c0_i32, %c0_i32_0 : i32, i32
  }
  func.func @transform_6(%arg0: i32, %arg1: i32) -> (i32, i32, i32) {
    %c0_i32 = arith.constant 0 : i32
    %c0_i32_0 = arith.constant 0 : i32
    %c0_i32_1 = arith.constant 0 : i32
    return %arg1, %c0_i32, %c0_i32_0 : i32, i32, i32
  }
  func.func @transform_7(%arg0: i32, %arg1: i32) -> (i32, i32) {
    %c0_i32 = arith.constant 0 : i32
    %c0_i32_0 = arith.constant 0 : i32
    %c0_i32_1 = arith.constant 0 : i32
    return %c0_i32, %c0_i32_0 : i32, i32
  }
  func.func @transform_8(%arg0: i32, %arg1: i32) -> (i32, i32) {
    %c0_i32 = arith.constant 0 : i32
    %c0_i32_0 = arith.constant 0 : i32
    %c0_i32_1 = arith.constant 0 : i32
    return %c0_i32, %c0_i32_0 : i32, i32
  }
  func.func @transform_9(%arg0: i32, %arg1: i32) -> (i32, i32) {
    %c0_i32 = arith.constant 0 : i32
    %c0_i32_0 = arith.constant 0 : i32
    %c0_i32_1 = arith.constant 0 : i32
    return %c0_i32, %c0_i32_0 : i32, i32
  }
  func.func @transform_10(%arg0: i32, %arg1: i32) -> (i32, i32) {
    %c0_i32 = arith.constant 0 : i32
    %c0_i32_0 = arith.constant 0 : i32
    %c0_i32_1 = arith.constant 0 : i32
    return %c0_i32, %c0_i32_0 : i32, i32
  }
  func.func @transform_11(%arg0: i32, %arg1: i32) -> (i32, i32) {
    %c0_i32 = arith.constant 0 : i32
    %c0_i32_0 = arith.constant 0 : i32
    %c0_i32_1 = arith.constant 0 : i32
    return %c0_i32, %c0_i32_0 : i32, i32
  }
  func.func @transform_12(%arg0: i32, %arg1: i32) -> (i32, i32) {
    %c0_i32 = arith.constant 0 : i32
    %c0_i32_0 = arith.constant 0 : i32
    %c0_i32_1 = arith.constant 0 : i32
    return %c0_i32, %c0_i32_0 : i32, i32
  }
  func.func @transform_13(%arg0: i32, %arg1: i32) -> (i32, i32) {
    %c0_i32 = arith.constant 0 : i32
    %c0_i32_0 = arith.constant 0 : i32
    %c0_i32_1 = arith.constant 0 : i32
    return %c0_i32, %c0_i32_0 : i32, i32
  }
  func.func @transform_14(%arg0: i32, %arg1: i32) -> (i32, i32) {
    %c0_i32 = arith.constant 0 : i32
    %c0_i32_0 = arith.constant 0 : i32
    %c0_i32_1 = arith.constant 0 : i32
    return %c0_i32, %c0_i32_0 : i32, i32
  }
  func.func @transform_15(%arg0: i32, %arg1: i32) -> (i32, i32) {
    %c0_i32 = arith.constant 0 : i32
    %c0_i32_0 = arith.constant 0 : i32
    %c0_i32_1 = arith.constant 0 : i32
    return %c0_i32, %c0_i32_0 : i32, i32
  }
  func.func @transform_16(%arg0: i32, %arg1: i32) -> (i32, i32, i32) {
    %c0_i32 = arith.constant 0 : i32
    %c0_i32_0 = arith.constant 0 : i32
    %c0_i32_1 = arith.constant 0 : i32
    return %arg0, %c0_i32, %c0_i32_0 : i32, i32, i32
  }
}

module attributes {stable_mosaic.version = 11 : i64} {
  func.func @attn_kernel(%arg0: i32, %arg1: i32, %arg2: memref<1x8x32xf32, #tpu.memory_space<vmem>>, %arg3: memref<1x1x8x8xf32, #tpu.memory_space<vmem>>, %arg4: memref<1x1x8x8xf32, #tpu.memory_space<vmem>>, %arg5: memref<1x1x8xf32, #tpu.memory_space<vmem>>, %arg6: memref<8x8xbf16, #tpu.memory_space<vmem>>, %arg7: memref<8x16xbf16, #tpu.memory_space<vmem>>, %arg8: memref<1x8x32xbf16, #tpu.memory_space<vmem>>, %arg9: memref<1x32xf32, #tpu.memory_space<vmem>>, %arg10: memref<1x32xf32, #tpu.memory_space<vmem>>, %arg11: memref<1x32xf32, #tpu.memory_space<vmem>>, %arg12: memref<1x8x32xf32, #tpu.memory_space<vmem>>, %arg13: memref<8x32xf32, #tpu.memory_space<vmem>>) attributes {dimension_semantics = [#tpu.dimension_semantics<parallel>, #tpu.dimension_semantics<arbitrary>], iteration_bounds = array<i64: 2, 4>, scalar_prefetch = 0 : i64, scratch_operands = 1 : i64, tpu.core_type = #tpu.core_type<tc>, window_params = [{transform_indices = @transform_0, window_bounds = array<i64: 1, 8, 32>}, {transform_indices = @transform_1, window_bounds = array<i64: 1, 1, 8, 8>}, {transform_indices = @transform_2, window_bounds = array<i64: 1, 1, 8, 8>}, {transform_indices = @transform_3, window_bounds = array<i64: 1, 1, 8>}, {pipeline_mode = #tpu.pipeline_mode<synchronous>, transform_indices = @transform_4, window_bounds = array<i64: 8, 8>}, {pipeline_mode = #tpu.pipeline_mode<synchronous>, transform_indices = @transform_5, window_bounds = array<i64: 8, 16>}, {transform_indices = @transform_6, window_bounds = array<i64: 1, 8, 32>}, {pipeline_mode = #tpu.pipeline_mode<synchronous>, transform_indices = @transform_7, window_bounds = array<i64: 1, 32>}, {pipeline_mode = #tpu.pipeline_mode<synchronous>, transform_indices = @transform_8, window_bounds = array<i64: 1, 32>}, {pipeline_mode = #tpu.pipeline_mode<synchronous>, transform_indices = @transform_9, window_bounds = array<i64: 1, 32>}, {transform_indices = @transform_10, window_bounds = array<i64: 1, 8, 32>}]} {
    %c0_i32 = arith.constant 0 : i32
    %0 = arith.cmpi eq, %arg1, %c0_i32 : i32
    %1 = arith.extui %0 : i1 to i32
    %c0_i32_0 = arith.constant 0 : i32
    %2 = arith.cmpi ne, %1, %c0_i32_0 : i32
    scf.if %2 {
      %cst_32 = arith.constant 0.000000e+00 : f32
      %54 = vector.broadcast %cst_32 : f32 to vector<8x32xf32>
      %c0_33 = arith.constant 0 : index
      %c0_34 = arith.constant 0 : index
      %55 = vector.load %arg13[%c0_33, %c0_34] : memref<8x32xf32, #tpu.memory_space<vmem>>, vector<8x32xf32>
      tpu.vector_store %arg13[%c0_33, %c0_34], %54 {strides = array<i32>} : memref<8x32xf32, #tpu.memory_space<vmem>>, vector<8x32xf32>,
    } else {
    }
    %c0 = arith.constant 0 : index
    %c0_1 = arith.constant 0 : index
    %3 = vector.load %arg13[%c0, %c0_1] : memref<8x32xf32, #tpu.memory_space<vmem>>, vector<8x32xf32>
    %c0_2 = arith.constant 0 : index
    %c0_3 = arith.constant 0 : index
    %c0_4 = arith.constant 0 : index
    %c0_5 = arith.constant 0 : index
    %4 = vector.load %arg3[%c0_2, %c0_3, %c0_4, %c0_5] : memref<1x1x8x8xf32, #tpu.memory_space<vmem>>, vector<1x1x8x8xf32>
    %5 = vector.shape_cast %4 : vector<1x1x8x8xf32> to vector<8x8xf32>
    %6 = arith.truncf %5 : vector<8x8xf32> to vector<8x8xbf16>
    %c0_6 = arith.constant 0 : index
    %c0_7 = arith.constant 0 : index
    %c0_8 = arith.constant 0 : index
    %c0_9 = arith.constant 0 : index
    %7 = vector.load %arg4[%c0_6, %c0_7, %c0_8, %c0_9] : memref<1x1x8x8xf32, #tpu.memory_space<vmem>>, vector<1x1x8x8xf32>
    %8 = vector.shape_cast %7 : vector<1x1x8x8xf32> to vector<8x8xf32>
    %9 = arith.truncf %8 : vector<8x8xf32> to vector<8x8xbf16>
    %c0_10 = arith.constant 0 : index
    %c0_11 = arith.constant 0 : index
    %10 = vector.load %arg6[%c0_10, %c0_11] : memref<8x8xbf16, #tpu.memory_space<vmem>>, vector<8x8xbf16>
    %cst = arith.constant dense<0.000000e+00> : vector<8x8xf32>
    %11 = tpu.matmul %6, %10, %cst {dimension_numbers = #tpu.dot_dimension_numbers<[1], [0], [0], [1], [0, 0, 1, 1], [], []>} : vector<8x8xbf16>, vector<8x8xbf16>, vector<8x8xf32> -> vector<8x8xf32>
    %c0_12 = arith.constant 0 : index
    %c0_13 = arith.constant 0 : index
    %12 = vector.load %arg7[%c0_12, %c0_13] : memref<8x16xbf16, #tpu.memory_space<vmem>>, vector<8x16xbf16>
    %cst_14 = arith.constant dense<0.000000e+00> : vector<8x16xf32>
    %13 = tpu.matmul %9, %12, %cst_14 {dimension_numbers = #tpu.dot_dimension_numbers<[1], [0], [0], [1], [0, 0, 1, 1], [], []>} : vector<8x8xbf16>, vector<8x16xbf16>, vector<8x16xf32> -> vector<8x16xf32>
    %14 = vector.extract_strided_slice %13 {offsets = [0, 0], sizes = [8, 8], strides = [1, 1]} : vector<8x16xf32> to vector<8x8xf32>
    %15 = vector.extract_strided_slice %13 {offsets = [0, 8], sizes = [8, 8], strides = [1, 1]} : vector<8x16xf32> to vector<8x8xf32>
    %16 = arith.truncf %11 : vector<8x8xf32> to vector<8x8xbf16>
    %17 = arith.truncf %14 : vector<8x8xf32> to vector<8x8xbf16>
    %cst_15 = arith.constant dense<0.000000e+00> : vector<8x8xf32>
    %18 = tpu.matmul %16, %17, %cst_15 {dimension_numbers = #tpu.dot_dimension_numbers<[1], [1], [0], [0], [0, 0, 1, 0], [], []>} : vector<8x8xbf16>, vector<8x8xbf16>, vector<8x8xf32> -> vector<8x8xf32>
    %c0_16 = arith.constant 0 : index
    %c0_17 = arith.constant 0 : index
    %c0_18 = arith.constant 0 : index
    %19 = vector.load %arg5[%c0_16, %c0_17, %c0_18] : memref<1x1x8xf32, #tpu.memory_space<vmem>>, vector<1x1x8xf32>
    %20 = vector.shape_cast %19 : vector<1x1x8xf32> to vector<1x8xf32>
    %cst_19 = arith.constant 0.000000e+00 : f32
    %21 = vector.broadcast %cst_19 : f32 to vector<1x8xf32>
    %22 = arith.cmpf ogt, %20, %21 : vector<1x8xf32>
    %23 = tpu.iota {dimensions = array<i32: 0>} : vector<8x8xi32>
    %24 = tpu.iota {dimensions = array<i32: 1>} : vector<8x8xi32>
    %25 = arith.cmpi sge, %23, %24 : vector<8x8xi32>
    %26 = vector.broadcast %22 : vector<1x8xi1> to vector<8x8xi1>
    %27 = arith.andi %26, %25 : vector<8x8xi1>
    %cst_20 = arith.constant -1.000000e+20 : f32
    %28 = vector.broadcast %cst_20 : f32 to vector<8x8xf32>
    %29 = arith.select %27, %18, %28 : vector<8x8xi1>, vector<8x8xf32>
    %cst_21 = arith.constant 0.176776692 : f32
    %30 = vector.broadcast %cst_21 : f32 to vector<8x8xf32>
    %31 = arith.mulf %29, %30 : vector<8x8xf32>
    %cst_22 = arith.constant dense<0xFF800000> : vector<8xf32>
    %32 = vector.multi_reduction <maximumf>, %31, %cst_22 [1] : vector<8x8xf32> to vector<8xf32>
    %33 = vector.shape_cast %32 : vector<8xf32> to vector<8x1xf32>
    %34 = vector.broadcast %33 : vector<8x1xf32> to vector<8x8xf32>
    %35 = arith.subf %31, %34 : vector<8x8xf32>
    %36 = math.exp %35 : vector<8x8xf32>
    %cst_23 = arith.constant dense<0.000000e+00> : vector<8xf32>
    %37 = vector.multi_reduction <add>, %36, %cst_23 [1] : vector<8x8xf32> to vector<8xf32>
    %38 = vector.shape_cast %37 : vector<8xf32> to vector<8x1xf32>
    %39 = tpu.reciprocal %38 {approx = true} : vector<8x1xf32> -> vector<8x1xf32>
    %40 = vector.broadcast %39 : vector<8x1xf32> to vector<8x8xf32>
    %41 = arith.mulf %36, %40 : vector<8x8xf32>
    %42 = arith.truncf %41 : vector<8x8xf32> to vector<8x8xbf16>
    %43 = arith.truncf %15 : vector<8x8xf32> to vector<8x8xbf16>
    %cst_24 = arith.constant dense<0.000000e+00> : vector<8x8xf32>
    %44 = tpu.matmul %42, %43, %cst_24 {dimension_numbers = #tpu.dot_dimension_numbers<[1], [0], [0], [1], [0, 0, 1, 1], [], []>} : vector<8x8xbf16>, vector<8x8xbf16>, vector<8x8xf32> -> vector<8x8xf32>
    %45 = arith.truncf %44 : vector<8x8xf32> to vector<8x8xbf16>
    %c0_25 = arith.constant 0 : index
    %c0_26 = arith.constant 0 : index
    %c0_27 = arith.constant 0 : index
    %46 = vector.load %arg8[%c0_25, %c0_26, %c0_27] : memref<1x8x32xbf16, #tpu.memory_space<vmem>>, vector<1x8x32xbf16>
    %47 = vector.shape_cast %46 : vector<1x8x32xbf16> to vector<8x32xbf16>
    %cst_28 = arith.constant dense<0.000000e+00> : vector<8x32xf32>
    %48 = tpu.matmul %45, %47, %cst_28 {dimension_numbers = #tpu.dot_dimension_numbers<[1], [0], [0], [1], [0, 0, 1, 1], [], []>} : vector<8x8xbf16>, vector<8x32xbf16>, vector<8x32xf32> -> vector<8x32xf32>
    %49 = arith.addf %3, %48 : vector<8x32xf32>
    %c0_29 = arith.constant 0 : index
    %c0_30 = arith.constant 0 : index
    %50 = vector.load %arg13[%c0_29, %c0_30] : memref<8x32xf32, #tpu.memory_space<vmem>>, vector<8x32xf32>
    tpu.vector_store %arg13[%c0_29, %c0_30], %49 {strides = array<i32>} : memref<8x32xf32, #tpu.memory_space<vmem>>, vector<8x32xf32>,
    %c3_i32 = arith.constant 3 : i32
    %51 = arith.cmpi eq, %arg1, %c3_i32 : i32
    %52 = arith.extui %51 : i1 to i32
    %c0_i32_31 = arith.constant 0 : i32
    %53 = arith.cmpi ne, %52, %c0_i32_31 : i32
    scf.if %53 {
      %c0_32 = arith.constant 0 : index
      %c0_33 = arith.constant 0 : index
      %54 = vector.load %arg13[%c0_32, %c0_33] : memref<8x32xf32, #tpu.memory_space<vmem>>, vector<8x32xf32>
      %c0_34 = arith.constant 0 : index
      %c0_35 = arith.constant 0 : index
      %55 = vector.load %arg9[%c0_34, %c0_35] : memref<1x32xf32, #tpu.memory_space<vmem>>, vector<1x32xf32>
      %56 = vector.broadcast %55 : vector<1x32xf32> to vector<8x32xf32>
      %57 = arith.addf %54, %56 : vector<8x32xf32>
      %c0_36 = arith.constant 0 : index
      %c0_37 = arith.constant 0 : index
      %c0_38 = arith.constant 0 : index
      %58 = vector.load %arg2[%c0_36, %c0_37, %c0_38] : memref<1x8x32xf32, #tpu.memory_space<vmem>>, vector<1x8x32xf32>
      %59 = vector.shape_cast %58 : vector<1x8x32xf32> to vector<8x32xf32>
      %60 = arith.addf %57, %59 : vector<8x32xf32>
      %c0_39 = arith.constant 0 : index
      %c0_40 = arith.constant 0 : index
      %61 = vector.load %arg10[%c0_39, %c0_40] : memref<1x32xf32, #tpu.memory_space<vmem>>, vector<1x32xf32>
      %c0_41 = arith.constant 0 : index
      %c0_42 = arith.constant 0 : index
      %62 = vector.load %arg11[%c0_41, %c0_42] : memref<1x32xf32, #tpu.memory_space<vmem>>, vector<1x32xf32>
      %cst_43 = arith.constant dense<0.000000e+00> : vector<8xf32>
      %63 = vector.multi_reduction <add>, %60, %cst_43 [1] : vector<8x32xf32> to vector<8xf32>
      %64 = vector.shape_cast %63 : vector<8xf32> to vector<8x1xf32>
      %cst_44 = arith.constant 3.200000e+01 : f32
      %65 = vector.broadcast %cst_44 : f32 to vector<8x1xf32>
      %66 = arith.divf %64, %65 : vector<8x1xf32>
      %67 = vector.broadcast %66 : vector<8x1xf32> to vector<8x32xf32>
      %68 = arith.subf %60, %67 : vector<8x32xf32>
      %69 = arith.mulf %68, %68 : vector<8x32xf32>
      %cst_45 = arith.constant dense<0.000000e+00> : vector<8xf32>
      %70 = vector.multi_reduction <add>, %69, %cst_45 [1] : vector<8x32xf32> to vector<8xf32>
      %71 = vector.shape_cast %70 : vector<8xf32> to vector<8x1xf32>
      %cst_46 = arith.constant 3.200000e+01 : f32
      %72 = vector.broadcast %cst_46 : f32 to vector<8x1xf32>
      %73 = arith.divf %71, %72 : vector<8x1xf32>
      %74 = vector.broadcast %66 : vector<8x1xf32> to vector<8x32xf32>
      %75 = arith.subf %60, %74 : vector<8x32xf32>
      %cst_47 = arith.constant 9.99999974E-6 : f32
      %76 = vector.broadcast %cst_47 : f32 to vector<8x1xf32>
      %77 = arith.addf %73, %76 : vector<8x1xf32>
      %78 = math.rsqrt %77 : vector<8x1xf32>
      %79 = vector.broadcast %78 : vector<8x1xf32> to vector<8x32xf32>
      %80 = arith.mulf %75, %79 : vector<8x32xf32>
      %81 = vector.broadcast %61 : vector<1x32xf32> to vector<8x32xf32>
      %82 = arith.mulf %80, %81 : vector<8x32xf32>
      %83 = vector.broadcast %62 : vector<1x32xf32> to vector<8x32xf32>
      %84 = arith.addf %82, %83 : vector<8x32xf32>
      %c0_48 = arith.constant 0 : index
      %c0_49 = arith.constant 0 : index
      %c0_50 = arith.constant 0 : index
      %85 = vector.load %arg12[%c0_48, %c0_49, %c0_50] : memref<1x8x32xf32, #tpu.memory_space<vmem>>, vector<1x8x32xf32>
      %86 = vector.shape_cast %85 : vector<1x8x32xf32> to vector<8x32xf32>
      %87 = vector.shape_cast %84 : vector<8x32xf32> to vector<1x8x32xf32>
      tpu.vector_store %arg12[%c0_48, %c0_49, %c0_50], %87 {strides = array<i32>} : memref<1x8x32xf32, #tpu.memory_space<vmem>>, vector<1x8x32xf32>,
    } else {
    }
    return
  }
  func.func @transform_0(%arg0: i32, %arg1: i32) -> (i32, i32, i32) {
    %c0_i32 = arith.constant 0 : i32
    %c0_i32_0 = arith.constant 0 : i32
    %c0_i32_1 = arith.constant 0 : i32
    return %arg0, %c0_i32, %c0_i32_0 : i32, i32, i32
  }
  func.func @transform_1(%arg0: i32, %arg1: i32) -> (i32, i32, i32, i32) {
    %c0_i32 = arith.constant 0 : i32
    %c0_i32_0 = arith.constant 0 : i32
    %c0_i32_1 = arith.constant 0 : i32
    return %arg0, %arg1, %c0_i32, %c0_i32_0 : i32, i32, i32, i32
  }
  func.func @transform_2(%arg0: i32, %arg1: i32) -> (i32, i32, i32, i32) {
    %c0_i32 = arith.constant 0 : i32
    %c0_i32_0 = arith.constant 0 : i32
    %c0_i32_1 = arith.constant 0 : i32
    return %arg0, %arg1, %c0_i32, %c0_i32_0 : i32, i32, i32, i32
  }
  func.func @transform_3(%arg0: i32, %arg1: i32) -> (i32, i32, i32) {
    %c0_i32 = arith.constant 0 : i32
    %c0_i32_0 = arith.constant 0 : i32
    %c0_i32_1 = arith.constant 0 : i32
    return %arg0, %c0_i32, %c0_i32_0 : i32, i32, i32
  }
  func.func @transform_4(%arg0: i32, %arg1: i32) -> (i32, i32) {
    %c0_i32 = arith.constant 0 : i32
    %c0_i32_0 = arith.constant 0 : i32
    %c0_i32_1 = arith.constant 0 : i32
    return %c0_i32, %c0_i32_0 : i32, i32
  }
  func.func @transform_5(%arg0: i32, %arg1: i32) -> (i32, i32) {
    %c0_i32 = arith.constant 0 : i32
    %c0_i32_0 = arith.constant 0 : i32
    %c0_i32_1 = arith.constant 0 : i32
    return %c0_i32, %c0_i32_0 : i32, i32
  }
  func.func @transform_6(%arg0: i32, %arg1: i32) -> (i32, i32, i32) {
    %c0_i32 = arith.constant 0 : i32
    %c0_i32_0 = arith.constant 0 : i32
    %c0_i32_1 = arith.constant 0 : i32
    return %arg1, %c0_i32, %c0_i32_0 : i32, i32, i32
  }
  func.func @transform_7(%arg0: i32, %arg1: i32) -> (i32, i32) {
    %c0_i32 = arith.constant 0 : i32
    %c0_i32_0 = arith.constant 0 : i32
    %c0_i32_1 = arith.constant 0 : i32
    return %c0_i32, %c0_i32_0 : i32, i32
  }
  func.func @transform_8(%arg0: i32, %arg1: i32) -> (i32, i32) {
    %c0_i32 = arith.constant 0 : i32
    %c0_i32_0 = arith.constant 0 : i32
    %c0_i32_1 = arith.constant 0 : i32
    return %c0_i32, %c0_i32_0 : i32, i32
  }
  func.func @transform_9(%arg0: i32, %arg1: i32) -> (i32, i32) {
    %c0_i32 = arith.constant 0 : i32
    %c0_i32_0 = arith.constant 0 : i32
    %c0_i32_1 = arith.constant 0 : i32
    return %c0_i32, %c0_i32_0 : i32, i32
  }
  func.func @transform_10(%arg0: i32, %arg1: i32) -> (i32, i32, i32) {
    %c0_i32 = arith.constant 0 : i32
    %c0_i32_0 = arith.constant 0 : i32
    %c0_i32_1 = arith.constant 0 : i32
    return %arg0, %c0_i32, %c0_i32_0 : i32, i32, i32
  }
}

module attributes {stable_mosaic.version = 11 : i64} {
  func.func @head_softmax_kernel(%arg0: i32, %arg1: memref<16x32xf32, #tpu.memory_space<vmem>>, %arg2: memref<32x60xbf16, #tpu.memory_space<vmem>>, %arg3: memref<1x60xf32, #tpu.memory_space<vmem>>, %arg4: memref<16x60xf32, #tpu.memory_space<vmem>>) attributes {dimension_semantics = [#tpu.dimension_semantics<parallel>], iteration_bounds = array<i64: 1>, scalar_prefetch = 0 : i64, scratch_operands = 0 : i64, tpu.core_type = #tpu.core_type<tc>, window_params = [{transform_indices = @transform_0, window_bounds = array<i64: 16, 32>}, {pipeline_mode = #tpu.pipeline_mode<synchronous>, transform_indices = @transform_1, window_bounds = array<i64: 32, 60>}, {pipeline_mode = #tpu.pipeline_mode<synchronous>, transform_indices = @transform_2, window_bounds = array<i64: 1, 60>}, {transform_indices = @transform_3, window_bounds = array<i64: 16, 60>}]} {
    %c0 = arith.constant 0 : index
    %c0_0 = arith.constant 0 : index
    %0 = vector.load %arg1[%c0, %c0_0] : memref<16x32xf32, #tpu.memory_space<vmem>>, vector<16x32xf32>
    %1 = arith.truncf %0 : vector<16x32xf32> to vector<16x32xbf16>
    %c0_1 = arith.constant 0 : index
    %c0_2 = arith.constant 0 : index
    %2 = vector.load %arg2[%c0_1, %c0_2] : memref<32x60xbf16, #tpu.memory_space<vmem>>, vector<32x60xbf16>
    %cst = arith.constant dense<0.000000e+00> : vector<16x60xf32>
    %3 = tpu.matmul %1, %2, %cst {dimension_numbers = #tpu.dot_dimension_numbers<[1], [0], [0], [1], [0, 0, 1, 1], [], []>} : vector<16x32xbf16>, vector<32x60xbf16>, vector<16x60xf32> -> vector<16x60xf32>
    %c0_3 = arith.constant 0 : index
    %c0_4 = arith.constant 0 : index
    %4 = vector.load %arg3[%c0_3, %c0_4] : memref<1x60xf32, #tpu.memory_space<vmem>>, vector<1x60xf32>
    %5 = vector.broadcast %4 : vector<1x60xf32> to vector<16x60xf32>
    %6 = arith.addf %3, %5 : vector<16x60xf32>
    %cst_5 = arith.constant dense<0xFF800000> : vector<16xf32>
    %7 = vector.multi_reduction <maximumf>, %6, %cst_5 [1] : vector<16x60xf32> to vector<16xf32>
    %8 = vector.shape_cast %7 : vector<16xf32> to vector<16x1xf32>
    %9 = vector.broadcast %8 : vector<16x1xf32> to vector<16x60xf32>
    %10 = arith.subf %6, %9 : vector<16x60xf32>
    %11 = math.exp %10 : vector<16x60xf32>
    %cst_6 = arith.constant dense<0.000000e+00> : vector<16xf32>
    %12 = vector.multi_reduction <add>, %11, %cst_6 [1] : vector<16x60xf32> to vector<16xf32>
    %13 = vector.shape_cast %12 : vector<16xf32> to vector<16x1xf32>
    %14 = vector.broadcast %13 : vector<16x1xf32> to vector<16x60xf32>
    %15 = arith.divf %11, %14 : vector<16x60xf32>
    %c0_7 = arith.constant 0 : index
    %c0_8 = arith.constant 0 : index
    %16 = vector.load %arg4[%c0_7, %c0_8] : memref<16x60xf32, #tpu.memory_space<vmem>>, vector<16x60xf32>
    tpu.vector_store %arg4[%c0_7, %c0_8], %15 {strides = array<i32>} : memref<16x60xf32, #tpu.memory_space<vmem>>, vector<16x60xf32>,
    return
  }
  func.func @transform_0(%arg0: i32) -> (i32, i32) {
    %c0_i32 = arith.constant 0 : i32
    %c0_i32_0 = arith.constant 0 : i32
    return %arg0, %c0_i32 : i32, i32
  }
  func.func @transform_1(%arg0: i32) -> (i32, i32) {
    %c0_i32 = arith.constant 0 : i32
    %c0_i32_0 = arith.constant 0 : i32
    %c0_i32_1 = arith.constant 0 : i32
    return %c0_i32, %c0_i32_0 : i32, i32
  }
  func.func @transform_2(%arg0: i32) -> (i32, i32) {
    %c0_i32 = arith.constant 0 : i32
    %c0_i32_0 = arith.constant 0 : i32
    %c0_i32_1 = arith.constant 0 : i32
    return %c0_i32, %c0_i32_0 : i32, i32
  }
  func.func @transform_3(%arg0: i32) -> (i32, i32) {
    %c0_i32 = arith.constant 0 : i32
    %c0_i32_0 = arith.constant 0 : i32
    return %arg0, %c0_i32 : i32, i32
  }
}

module attributes {stable_mosaic.version = 11 : i64} {
  func.func @attn_ffn_kernel(%arg0: i32, %arg1: i32, %arg2: memref<1x8x32xf32, #tpu.memory_space<vmem>>, %arg3: memref<1x1x8x8xf32, #tpu.memory_space<vmem>>, %arg4: memref<1x1x12x8xf32, #tpu.memory_space<vmem>>, %arg5: memref<1x1x12xf32, #tpu.memory_space<vmem>>, %arg6: memref<8x8xbf16, #tpu.memory_space<vmem>>, %arg7: memref<8x16xbf16, #tpu.memory_space<vmem>>, %arg8: memref<1x8x32xbf16, #tpu.memory_space<vmem>>, %arg9: memref<1x32xf32, #tpu.memory_space<vmem>>, %arg10: memref<1x32xf32, #tpu.memory_space<vmem>>, %arg11: memref<1x32xf32, #tpu.memory_space<vmem>>, %arg12: memref<32x128xbf16, #tpu.memory_space<vmem>>, %arg13: memref<1x128xf32, #tpu.memory_space<vmem>>, %arg14: memref<128x32xbf16, #tpu.memory_space<vmem>>, %arg15: memref<1x32xf32, #tpu.memory_space<vmem>>, %arg16: memref<1x32xf32, #tpu.memory_space<vmem>>, %arg17: memref<1x32xf32, #tpu.memory_space<vmem>>, %arg18: memref<1x8x32xf32, #tpu.memory_space<vmem>>, %arg19: memref<8x32xf32, #tpu.memory_space<vmem>>) attributes {dimension_semantics = [#tpu.dimension_semantics<parallel>, #tpu.dimension_semantics<arbitrary>], iteration_bounds = array<i64: 2, 4>, scalar_prefetch = 0 : i64, scratch_operands = 1 : i64, tpu.core_type = #tpu.core_type<tc>, window_params = [{transform_indices = @transform_0, window_bounds = array<i64: 1, 8, 32>}, {transform_indices = @transform_1, window_bounds = array<i64: 1, 1, 8, 8>}, {transform_indices = @transform_2, window_bounds = array<i64: 1, 1, 12, 8>}, {transform_indices = @transform_3, window_bounds = array<i64: 1, 1, 12>}, {pipeline_mode = #tpu.pipeline_mode<synchronous>, transform_indices = @transform_4, window_bounds = array<i64: 8, 8>}, {pipeline_mode = #tpu.pipeline_mode<synchronous>, transform_indices = @transform_5, window_bounds = array<i64: 8, 16>}, {transform_indices = @transform_6, window_bounds = array<i64: 1, 8, 32>}, {pipeline_mode = #tpu.pipeline_mode<synchronous>, transform_indices = @transform_7, window_bounds = array<i64: 1, 32>}, {pipeline_mode = #tpu.pipeline_mode<synchronous>, transform_indices = @transform_8, window_bounds = array<i64: 1, 32>}, {pipeline_mode = #tpu.pipeline_mode<synchronous>, transform_indices = @transform_9, window_bounds = array<i64: 1, 32>}, {pipeline_mode = #tpu.pipeline_mode<synchronous>, transform_indices = @transform_10, window_bounds = array<i64: 32, 128>}, {pipeline_mode = #tpu.pipeline_mode<synchronous>, transform_indices = @transform_11, window_bounds = array<i64: 1, 128>}, {pipeline_mode = #tpu.pipeline_mode<synchronous>, transform_indices = @transform_12, window_bounds = array<i64: 128, 32>}, {pipeline_mode = #tpu.pipeline_mode<synchronous>, transform_indices = @transform_13, window_bounds = array<i64: 1, 32>}, {pipeline_mode = #tpu.pipeline_mode<synchronous>, transform_indices = @transform_14, window_bounds = array<i64: 1, 32>}, {pipeline_mode = #tpu.pipeline_mode<synchronous>, transform_indices = @transform_15, window_bounds = array<i64: 1, 32>}, {transform_indices = @transform_16, window_bounds = array<i64: 1, 8, 32>}]} {
    %c0_i32 = arith.constant 0 : i32
    %0 = arith.cmpi eq, %arg1, %c0_i32 : i32
    %1 = arith.extui %0 : i1 to i32
    %c0_i32_0 = arith.constant 0 : i32
    %2 = arith.cmpi ne, %1, %c0_i32_0 : i32
    scf.if %2 {
      %cst_32 = arith.constant 0.000000e+00 : f32
      %51 = vector.broadcast %cst_32 : f32 to vector<8x32xf32>
      %c0_33 = arith.constant 0 : index
      %c0_34 = arith.constant 0 : index
      %52 = vector.load %arg19[%c0_33, %c0_34] : memref<8x32xf32, #tpu.memory_space<vmem>>, vector<8x32xf32>
      tpu.vector_store %arg19[%c0_33, %c0_34], %51 {strides = array<i32>} : memref<8x32xf32, #tpu.memory_space<vmem>>, vector<8x32xf32>,
    } else {
    }
    %c0 = arith.constant 0 : index
    %c0_1 = arith.constant 0 : index
    %3 = vector.load %arg19[%c0, %c0_1] : memref<8x32xf32, #tpu.memory_space<vmem>>, vector<8x32xf32>
    %c0_2 = arith.constant 0 : index
    %c0_3 = arith.constant 0 : index
    %c0_4 = arith.constant 0 : index
    %c0_5 = arith.constant 0 : index
    %4 = vector.load %arg3[%c0_2, %c0_3, %c0_4, %c0_5] : memref<1x1x8x8xf32, #tpu.memory_space<vmem>>, vector<1x1x8x8xf32>
    %5 = vector.shape_cast %4 : vector<1x1x8x8xf32> to vector<8x8xf32>
    %6 = arith.truncf %5 : vector<8x8xf32> to vector<8x8xbf16>
    %c0_6 = arith.constant 0 : index
    %c0_7 = arith.constant 0 : index
    %c0_8 = arith.constant 0 : index
    %c0_9 = arith.constant 0 : index
    %7 = vector.load %arg4[%c0_6, %c0_7, %c0_8, %c0_9] : memref<1x1x12x8xf32, #tpu.memory_space<vmem>>, vector<1x1x12x8xf32>
    %8 = vector.shape_cast %7 : vector<1x1x12x8xf32> to vector<12x8xf32>
    %9 = arith.truncf %8 : vector<12x8xf32> to vector<12x8xbf16>
    %c0_10 = arith.constant 0 : index
    %c0_11 = arith.constant 0 : index
    %10 = vector.load %arg6[%c0_10, %c0_11] : memref<8x8xbf16, #tpu.memory_space<vmem>>, vector<8x8xbf16>
    %cst = arith.constant dense<0.000000e+00> : vector<8x8xf32>
    %11 = tpu.matmul %6, %10, %cst {dimension_numbers = #tpu.dot_dimension_numbers<[1], [0], [0], [1], [0, 0, 1, 1], [], []>} : vector<8x8xbf16>, vector<8x8xbf16>, vector<8x8xf32> -> vector<8x8xf32>
    %c0_12 = arith.constant 0 : index
    %c0_13 = arith.constant 0 : index
    %12 = vector.load %arg7[%c0_12, %c0_13] : memref<8x16xbf16, #tpu.memory_space<vmem>>, vector<8x16xbf16>
    %cst_14 = arith.constant dense<0.000000e+00> : vector<12x16xf32>
    %13 = tpu.matmul %9, %12, %cst_14 {dimension_numbers = #tpu.dot_dimension_numbers<[1], [0], [0], [1], [0, 0, 1, 1], [], []>} : vector<12x8xbf16>, vector<8x16xbf16>, vector<12x16xf32> -> vector<12x16xf32>
    %14 = vector.extract_strided_slice %13 {offsets = [0, 0], sizes = [12, 8], strides = [1, 1]} : vector<12x16xf32> to vector<12x8xf32>
    %15 = vector.extract_strided_slice %13 {offsets = [0, 8], sizes = [12, 8], strides = [1, 1]} : vector<12x16xf32> to vector<12x8xf32>
    %16 = arith.truncf %11 : vector<8x8xf32> to vector<8x8xbf16>
    %17 = arith.truncf %14 : vector<12x8xf32> to vector<12x8xbf16>
    %cst_15 = arith.constant dense<0.000000e+00> : vector<8x12xf32>
    %18 = tpu.matmul %16, %17, %cst_15 {dimension_numbers = #tpu.dot_dimension_numbers<[1], [1], [0], [0], [0, 0, 1, 0], [], []>} : vector<8x8xbf16>, vector<12x8xbf16>, vector<8x12xf32> -> vector<8x12xf32>
    %c0_16 = arith.constant 0 : index
    %c0_17 = arith.constant 0 : index
    %c0_18 = arith.constant 0 : index
    %19 = vector.load %arg5[%c0_16, %c0_17, %c0_18] : memref<1x1x12xf32, #tpu.memory_space<vmem>>, vector<1x1x12xf32>
    %20 = vector.shape_cast %19 : vector<1x1x12xf32> to vector<1x12xf32>
    %cst_19 = arith.constant 0.000000e+00 : f32
    %21 = vector.broadcast %cst_19 : f32 to vector<1x12xf32>
    %22 = arith.cmpf ogt, %20, %21 : vector<1x12xf32>
    %cst_20 = arith.constant -1.000000e+20 : f32
    %23 = vector.shape_cast %22 : vector<1x12xi1> to vector<1x12xi1>
    %24 = vector.broadcast %23 : vector<1x12xi1> to vector<8x12xi1>
    %25 = vector.broadcast %cst_20 : f32 to vector<8x12xf32>
    %26 = arith.select %24, %18, %25 : vector<8x12xi1>, vector<8x12xf32>
    %cst_21 = arith.constant 0.176776692 : f32
    %27 = vector.broadcast %cst_21 : f32 to vector<8x12xf32>
    %28 = arith.mulf %26, %27 : vector<8x12xf32>
    %cst_22 = arith.constant dense<0xFF800000> : vector<8xf32>
    %29 = vector.multi_reduction <maximumf>, %28, %cst_22 [1] : vector<8x12xf32> to vector<8xf32>
    %30 = vector.shape_cast %29 : vector<8xf32> to vector<8x1xf32>
    %31 = vector.broadcast %30 : vector<8x1xf32> to vector<8x12xf32>
    %32 = arith.subf %28, %31 : vector<8x12xf32>
    %33 = math.exp %32 : vector<8x12xf32>
    %cst_23 = arith.constant dense<0.000000e+00> : vector<8xf32>
    %34 = vector.multi_reduction <add>, %33, %cst_23 [1] : vector<8x12xf32> to vector<8xf32>
    %35 = vector.shape_cast %34 : vector<8xf32> to vector<8x1xf32>
    %36 = tpu.reciprocal %35 {approx = true} : vector<8x1xf32> -> vector<8x1xf32>
    %37 = vector.broadcast %36 : vector<8x1xf32> to vector<8x12xf32>
    %38 = arith.mulf %33, %37 : vector<8x12xf32>
    %39 = arith.truncf %38 : vector<8x12xf32> to vector<8x12xbf16>
    %40 = arith.truncf %15 : vector<12x8xf32> to vector<12x8xbf16>
    %cst_24 = arith.constant dense<0.000000e+00> : vector<8x8xf32>
    %41 = tpu.matmul %39, %40, %cst_24 {dimension_numbers = #tpu.dot_dimension_numbers<[1], [0], [0], [1], [0, 0, 1, 1], [], []>} : vector<8x12xbf16>, vector<12x8xbf16>, vector<8x8xf32> -> vector<8x8xf32>
    %42 = arith.truncf %41 : vector<8x8xf32> to vector<8x8xbf16>
    %c0_25 = arith.constant 0 : index
    %c0_26 = arith.constant 0 : index
    %c0_27 = arith.constant 0 : index
    %43 = vector.load %arg8[%c0_25, %c0_26, %c0_27] : memref<1x8x32xbf16, #tpu.memory_space<vmem>>, vector<1x8x32xbf16>
    %44 = vector.shape_cast %43 : vector<1x8x32xbf16> to vector<8x32xbf16>
    %cst_28 = arith.constant dense<0.000000e+00> : vector<8x32xf32>
    %45 = tpu.matmul %42, %44, %cst_28 {dimension_numbers = #tpu.dot_dimension_numbers<[1], [0], [0], [1], [0, 0, 1, 1], [], []>} : vector<8x8xbf16>, vector<8x32xbf16>, vector<8x32xf32> -> vector<8x32xf32>
    %46 = arith.addf %3, %45 : vector<8x32xf32>
    %c0_29 = arith.constant 0 : index
    %c0_30 = arith.constant 0 : index
    %47 = vector.load %arg19[%c0_29, %c0_30] : memref<8x32xf32, #tpu.memory_space<vmem>>, vector<8x32xf32>
    tpu.vector_store %arg19[%c0_29, %c0_30], %46 {strides = array<i32>} : memref<8x32xf32, #tpu.memory_space<vmem>>, vector<8x32xf32>,
    %c3_i32 = arith.constant 3 : i32
    %48 = arith.cmpi eq, %arg1, %c3_i32 : i32
    %49 = arith.extui %48 : i1 to i32
    %c0_i32_31 = arith.constant 0 : i32
    %50 = arith.cmpi ne, %49, %c0_i32_31 : i32
    scf.if %50 {
      %c0_32 = arith.constant 0 : index
      %c0_33 = arith.constant 0 : index
      %c0_34 = arith.constant 0 : index
      %51 = vector.load %arg2[%c0_32, %c0_33, %c0_34] : memref<1x8x32xf32, #tpu.memory_space<vmem>>, vector<1x8x32xf32>
      %52 = vector.shape_cast %51 : vector<1x8x32xf32> to vector<8x32xf32>
      %c0_35 = arith.constant 0 : index
      %c0_36 = arith.constant 0 : index
      %53 = vector.load %arg19[%c0_35, %c0_36] : memref<8x32xf32, #tpu.memory_space<vmem>>, vector<8x32xf32>
      %c0_37 = arith.constant 0 : index
      %c0_38 = arith.constant 0 : index
      %54 = vector.load %arg9[%c0_37, %c0_38] : memref<1x32xf32, #tpu.memory_space<vmem>>, vector<1x32xf32>
      %55 = vector.broadcast %54 : vector<1x32xf32> to vector<8x32xf32>
      %56 = arith.addf %53, %55 : vector<8x32xf32>
      %57 = arith.addf %56, %52 : vector<8x32xf32>
      %c0_39 = arith.constant 0 : index
      %c0_40 = arith.constant 0 : index
      %58 = vector.load %arg10[%c0_39, %c0_40] : memref<1x32xf32, #tpu.memory_space<vmem>>, vector<1x32xf32>
      %c0_41 = arith.constant 0 : index
      %c0_42 = arith.constant 0 : index
      %59 = vector.load %arg11[%c0_41, %c0_42] : memref<1x32xf32, #tpu.memory_space<vmem>>, vector<1x32xf32>
      %cst_43 = arith.constant dense<0.000000e+00> : vector<8xf32>
      %60 = vector.multi_reduction <add>, %57, %cst_43 [1] : vector<8x32xf32> to vector<8xf32>
      %61 = vector.shape_cast %60 : vector<8xf32> to vector<8x1xf32>
      %cst_44 = arith.constant 3.200000e+01 : f32
      %62 = vector.broadcast %cst_44 : f32 to vector<8x1xf32>
      %63 = arith.divf %61, %62 : vector<8x1xf32>
      %64 = vector.broadcast %63 : vector<8x1xf32> to vector<8x32xf32>
      %65 = arith.subf %57, %64 : vector<8x32xf32>
      %66 = arith.mulf %65, %65 : vector<8x32xf32>
      %cst_45 = arith.constant dense<0.000000e+00> : vector<8xf32>
      %67 = vector.multi_reduction <add>, %66, %cst_45 [1] : vector<8x32xf32> to vector<8xf32>
      %68 = vector.shape_cast %67 : vector<8xf32> to vector<8x1xf32>
      %cst_46 = arith.constant 3.200000e+01 : f32
      %69 = vector.broadcast %cst_46 : f32 to vector<8x1xf32>
      %70 = arith.divf %68, %69 : vector<8x1xf32>
      %71 = vector.broadcast %63 : vector<8x1xf32> to vector<8x32xf32>
      %72 = arith.subf %57, %71 : vector<8x32xf32>
      %cst_47 = arith.constant 9.99999974E-6 : f32
      %73 = vector.broadcast %cst_47 : f32 to vector<8x1xf32>
      %74 = arith.addf %70, %73 : vector<8x1xf32>
      %75 = math.rsqrt %74 : vector<8x1xf32>
      %76 = vector.broadcast %75 : vector<8x1xf32> to vector<8x32xf32>
      %77 = arith.mulf %72, %76 : vector<8x32xf32>
      %78 = vector.broadcast %58 : vector<1x32xf32> to vector<8x32xf32>
      %79 = arith.mulf %77, %78 : vector<8x32xf32>
      %80 = vector.broadcast %59 : vector<1x32xf32> to vector<8x32xf32>
      %81 = arith.addf %79, %80 : vector<8x32xf32>
      %82 = arith.truncf %81 : vector<8x32xf32> to vector<8x32xbf16>
      %c0_48 = arith.constant 0 : index
      %c0_49 = arith.constant 0 : index
      %83 = vector.load %arg12[%c0_48, %c0_49] : memref<32x128xbf16, #tpu.memory_space<vmem>>, vector<32x128xbf16>
      %cst_50 = arith.constant dense<0.000000e+00> : vector<8x128xf32>
      %84 = tpu.matmul %82, %83, %cst_50 {dimension_numbers = #tpu.dot_dimension_numbers<[1], [0], [0], [1], [0, 0, 1, 1], [], []>} : vector<8x32xbf16>, vector<32x128xbf16>, vector<8x128xf32> -> vector<8x128xf32>
      %c0_51 = arith.constant 0 : index
      %c0_52 = arith.constant 0 : index
      %85 = vector.load %arg13[%c0_51, %c0_52] : memref<1x128xf32, #tpu.memory_space<vmem>>, vector<1x128xf32>
      %86 = vector.broadcast %85 : vector<1x128xf32> to vector<8x128xf32>
      %87 = arith.addf %84, %86 : vector<8x128xf32>
      %cst_53 = arith.constant 0.000000e+00 : f32
      %88 = vector.broadcast %cst_53 : f32 to vector<8x128xf32>
      %89 = arith.maximumf %87, %88 : vector<8x128xf32>
      %90 = arith.truncf %89 : vector<8x128xf32> to vector<8x128xbf16>
      %c0_54 = arith.constant 0 : index
      %c0_55 = arith.constant 0 : index
      %91 = vector.load %arg14[%c0_54, %c0_55] : memref<128x32xbf16, #tpu.memory_space<vmem>>, vector<128x32xbf16>
      %cst_56 = arith.constant dense<0.000000e+00> : vector<8x32xf32>
      %92 = tpu.matmul %90, %91, %cst_56 {dimension_numbers = #tpu.dot_dimension_numbers<[1], [0], [0], [1], [0, 0, 1, 1], [], []>} : vector<8x128xbf16>, vector<128x32xbf16>, vector<8x32xf32> -> vector<8x32xf32>
      %c0_57 = arith.constant 0 : index
      %c0_58 = arith.constant 0 : index
      %93 = vector.load %arg15[%c0_57, %c0_58] : memref<1x32xf32, #tpu.memory_space<vmem>>, vector<1x32xf32>
      %94 = vector.broadcast %93 : vector<1x32xf32> to vector<8x32xf32>
      %95 = arith.addf %92, %94 : vector<8x32xf32>
      %96 = arith.addf %95, %81 : vector<8x32xf32>
      %c0_59 = arith.constant 0 : index
      %c0_60 = arith.constant 0 : index
      %97 = vector.load %arg16[%c0_59, %c0_60] : memref<1x32xf32, #tpu.memory_space<vmem>>, vector<1x32xf32>
      %c0_61 = arith.constant 0 : index
      %c0_62 = arith.constant 0 : index
      %98 = vector.load %arg17[%c0_61, %c0_62] : memref<1x32xf32, #tpu.memory_space<vmem>>, vector<1x32xf32>
      %cst_63 = arith.constant dense<0.000000e+00> : vector<8xf32>
      %99 = vector.multi_reduction <add>, %96, %cst_63 [1] : vector<8x32xf32> to vector<8xf32>
      %100 = vector.shape_cast %99 : vector<8xf32> to vector<8x1xf32>
      %cst_64 = arith.constant 3.200000e+01 : f32
      %101 = vector.broadcast %cst_64 : f32 to vector<8x1xf32>
      %102 = arith.divf %100, %101 : vector<8x1xf32>
      %103 = vector.broadcast %102 : vector<8x1xf32> to vector<8x32xf32>
      %104 = arith.subf %96, %103 : vector<8x32xf32>
      %105 = arith.mulf %104, %104 : vector<8x32xf32>
      %cst_65 = arith.constant dense<0.000000e+00> : vector<8xf32>
      %106 = vector.multi_reduction <add>, %105, %cst_65 [1] : vector<8x32xf32> to vector<8xf32>
      %107 = vector.shape_cast %106 : vector<8xf32> to vector<8x1xf32>
      %cst_66 = arith.constant 3.200000e+01 : f32
      %108 = vector.broadcast %cst_66 : f32 to vector<8x1xf32>
      %109 = arith.divf %107, %108 : vector<8x1xf32>
      %110 = vector.broadcast %102 : vector<8x1xf32> to vector<8x32xf32>
      %111 = arith.subf %96, %110 : vector<8x32xf32>
      %cst_67 = arith.constant 9.99999974E-6 : f32
      %112 = vector.broadcast %cst_67 : f32 to vector<8x1xf32>
      %113 = arith.addf %109, %112 : vector<8x1xf32>
      %114 = math.rsqrt %113 : vector<8x1xf32>
      %115 = vector.broadcast %114 : vector<8x1xf32> to vector<8x32xf32>
      %116 = arith.mulf %111, %115 : vector<8x32xf32>
      %117 = vector.broadcast %97 : vector<1x32xf32> to vector<8x32xf32>
      %118 = arith.mulf %116, %117 : vector<8x32xf32>
      %119 = vector.broadcast %98 : vector<1x32xf32> to vector<8x32xf32>
      %120 = arith.addf %118, %119 : vector<8x32xf32>
      %c0_68 = arith.constant 0 : index
      %c0_69 = arith.constant 0 : index
      %c0_70 = arith.constant 0 : index
      %121 = vector.load %arg18[%c0_68, %c0_69, %c0_70] : memref<1x8x32xf32, #tpu.memory_space<vmem>>, vector<1x8x32xf32>
      %122 = vector.shape_cast %121 : vector<1x8x32xf32> to vector<8x32xf32>
      %123 = vector.shape_cast %120 : vector<8x32xf32> to vector<1x8x32xf32>
      tpu.vector_store %arg18[%c0_68, %c0_69, %c0_70], %123 {strides = array<i32>} : memref<1x8x32xf32, #tpu.memory_space<vmem>>, vector<1x8x32xf32>,
    } else {
    }
    return
  }
  func.func @transform_0(%arg0: i32, %arg1: i32) -> (i32, i32, i32) {
    %c0_i32 = arith.constant 0 : i32
    %c0_i32_0 = arith.constant 0 : i32
    %c0_i32_1 = arith.constant 0 : i32
    return %arg0, %c0_i32, %c0_i32_0 : i32, i32, i32
  }
  func.func @transform_1(%arg0: i32, %arg1: i32) -> (i32, i32, i32, i32) {
    %c0_i32 = arith.constant 0 : i32
    %c0_i32_0 = arith.constant 0 : i32
    %c0_i32_1 = arith.constant 0 : i32
    return %arg0, %arg1, %c0_i32, %c0_i32_0 : i32, i32, i32, i32
  }
  func.func @transform_2(%arg0: i32, %arg1: i32) -> (i32, i32, i32, i32) {
    %c0_i32 = arith.constant 0 : i32
    %c0_i32_0 = arith.constant 0 : i32
    %c0_i32_1 = arith.constant 0 : i32
    return %arg0, %arg1, %c0_i32, %c0_i32_0 : i32, i32, i32, i32
  }
  func.func @transform_3(%arg0: i32, %arg1: i32) -> (i32, i32, i32) {
    %c0_i32 = arith.constant 0 : i32
    %c0_i32_0 = arith.constant 0 : i32
    %c0_i32_1 = arith.constant 0 : i32
    return %arg0, %c0_i32, %c0_i32_0 : i32, i32, i32
  }
  func.func @transform_4(%arg0: i32, %arg1: i32) -> (i32, i32) {
    %c0_i32 = arith.constant 0 : i32
    %c0_i32_0 = arith.constant 0 : i32
    %c0_i32_1 = arith.constant 0 : i32
    return %c0_i32, %c0_i32_0 : i32, i32
  }
  func.func @transform_5(%arg0: i32, %arg1: i32) -> (i32, i32) {
    %c0_i32 = arith.constant 0 : i32
    %c0_i32_0 = arith.constant 0 : i32
    %c0_i32_1 = arith.constant 0 : i32
    return %c0_i32, %c0_i32_0 : i32, i32
  }
  func.func @transform_6(%arg0: i32, %arg1: i32) -> (i32, i32, i32) {
    %c0_i32 = arith.constant 0 : i32
    %c0_i32_0 = arith.constant 0 : i32
    %c0_i32_1 = arith.constant 0 : i32
    return %arg1, %c0_i32, %c0_i32_0 : i32, i32, i32
  }
  func.func @transform_7(%arg0: i32, %arg1: i32) -> (i32, i32) {
    %c0_i32 = arith.constant 0 : i32
    %c0_i32_0 = arith.constant 0 : i32
    %c0_i32_1 = arith.constant 0 : i32
    return %c0_i32, %c0_i32_0 : i32, i32
  }
  func.func @transform_8(%arg0: i32, %arg1: i32) -> (i32, i32) {
    %c0_i32 = arith.constant 0 : i32
    %c0_i32_0 = arith.constant 0 : i32
    %c0_i32_1 = arith.constant 0 : i32
    return %c0_i32, %c0_i32_0 : i32, i32
  }
  func.func @transform_9(%arg0: i32, %arg1: i32) -> (i32, i32) {
    %c0_i32 = arith.constant 0 : i32
    %c0_i32_0 = arith.constant 0 : i32
    %c0_i32_1 = arith.constant 0 : i32
    return %c0_i32, %c0_i32_0 : i32, i32
  }
  func.func @transform_10(%arg0: i32, %arg1: i32) -> (i32, i32) {
    %c0_i32 = arith.constant 0 : i32
    %c0_i32_0 = arith.constant 0 : i32
    %c0_i32_1 = arith.constant 0 : i32
    return %c0_i32, %c0_i32_0 : i32, i32
  }
  func.func @transform_11(%arg0: i32, %arg1: i32) -> (i32, i32) {
    %c0_i32 = arith.constant 0 : i32
    %c0_i32_0 = arith.constant 0 : i32
    %c0_i32_1 = arith.constant 0 : i32
    return %c0_i32, %c0_i32_0 : i32, i32
  }
  func.func @transform_12(%arg0: i32, %arg1: i32) -> (i32, i32) {
    %c0_i32 = arith.constant 0 : i32
    %c0_i32_0 = arith.constant 0 : i32
    %c0_i32_1 = arith.constant 0 : i32
    return %c0_i32, %c0_i32_0 : i32, i32
  }
  func.func @transform_13(%arg0: i32, %arg1: i32) -> (i32, i32) {
    %c0_i32 = arith.constant 0 : i32
    %c0_i32_0 = arith.constant 0 : i32
    %c0_i32_1 = arith.constant 0 : i32
    return %c0_i32, %c0_i32_0 : i32, i32
  }
  func.func @transform_14(%arg0: i32, %arg1: i32) -> (i32, i32) {
    %c0_i32 = arith.constant 0 : i32
    %c0_i32_0 = arith.constant 0 : i32
    %c0_i32_1 = arith.constant 0 : i32
    return %c0_i32, %c0_i32_0 : i32, i32
  }
  func.func @transform_15(%arg0: i32, %arg1: i32) -> (i32, i32) {
    %c0_i32 = arith.constant 0 : i32
    %c0_i32_0 = arith.constant 0 : i32
    %c0_i32_1 = arith.constant 0 : i32
    return %c0_i32, %c0_i32_0 : i32, i32
  }
  func.func @transform_16(%arg0: i32, %arg1: i32) -> (i32, i32, i32) {
    %c0_i32 = arith.constant 0 : i32
    %c0_i32_0 = arith.constant 0 : i32
    %c0_i32_1 = arith.constant 0 : i32
    return %arg0, %c0_i32, %c0_i32_0 : i32, i32, i32
  }
}

</mosaic_0001>

<bundles_post_ra>
// kernel: transformer_fwd.13
= control target key start
LH: loop header
LB: loop body
LE: loop exit
PB: predicated region body
PF: predicated region fallthrough
CT: control target
= control target key end

     0   :  { %v182_v1 = vmov 0.0   ;;  %vm183_vm0 = vmmov 0   ;;  %s240_s0 = inlined_call_operand.vmem [shape: f32[16,32], index: 0, kind: input, shape index: {}]   ;;  %s241_s1 = inlined_call_operand.vmem [shape: bf16[32,60], index: 1, kind: input, shape index: {}]   ;;  %s242_s2 = inlined_call_operand.vmem [shape: f32[1,60], index: 2, kind: input, shape index: {}]   ;;  %s243_s3 = inlined_call_operand.hbm [shape: f32[16,60], index: 3, kind: output, shape index: {}]  }
   0x1   :  { %v148_v0 = vld [vmem:[%s241_s1] sm:$0xff]   ;;  %135 = vmatprep.subr.bf16.mxu0 %v182_v1  ;;  %v149_v2 = vld [vmem:[%s241_s1 + $0x8] sm:$0xff]   ;;  %139 = vmatprep.mubr.msk.bf16.mxu0 %vm183_vm0, %v182_v1 }
   0x2   :  { %136 = vmatpush3.bf16.msra.mxu0 %v148_v0  ;;  %v16_v3 = vld [vmem:[%s240_s0] sm:$0xff]  ;;  %v17_v4 = vld [vmem:[%s240_s0 + $0x8] sm:$0xff] }
   0x3   :  { %137 = vmatprep.subr.bf16.mxu0 %v182_v1 }
   0x4   :  { %8 = vsyncpa [#allocation3], 0  ;;  %v18_v5 = vpack.c.bf16 %v17_v4, %v16_v3  ;;  %vm42_vm1 = vcmask 261120   ;;  %v128_v6 = vld [vmem:[%s242_s2] ss:$0 sm:$0xff]  ;;  %vm87_vm2 = vcmask 490496  }
   0x5   :  { %s184_s0 = smov [#allocation2]  }
   0x6   :  { %138 = vmatpush3.bf16.msra.mxu0 %v149_v2  ;;  %s117_s1 = sshll.u32 %s184_s0, 4  ;;  %s118_s1 = int_to_ptr.vmem [resolvable:$true] %s117_s1 }
   0x7   :  { %s158_s2 = scalar_lea.vmem %s118_s1, 256  ;;  %p163_p1 = scmp.lt.s32.totalorder %s118_s1, %s118_s1 }
   0x8   :  { %p159_p0 = scmp.ne.s32.totalorder %s118_s1, %s158_s2  ;;  %p164_p2 = scmp.lt.s32.totalorder %s158_s2, %s158_s2 }
   0x9   :  { %140 = vmatmul.mubr.msk.bf16.vlgmr.msra.gmra.mrb[0].mxu0 %vm42_vm1, %v18_v5 }
   0xa   :  { %p165_p3 = por %p164_p2, %p163_p1 }
   0xc   :  { %p166_p4 = pnand %p165_p3, %p159_p0 }
  0xdc   :  { %v80_v7 = vpop.f32.mrb[0].mxu0 }
  0xdd   :  { %v81_v8 = vadd.f32 %v128_v6, %v80_v7  ;;  %v141_v9 = vpop.f32.mrb[1].mxu0 }
  0xde   :  { %v83_v10 = vpop.f32.mrb[2].mxu0 }
  0xdf   :  { %v84_v11 = vadd.f32 %v128_v6, %v83_v10  ;;  %v142_v12 = vpop.f32.mrb[3].mxu0  ;;  %v88_v13 = vsel %vm87_vm2, %v81_v8, -inf }
  0xe0   :  { %89 = vmax.xlane.f32.xlu0 %v88_v13 }
  0xe1   :  { %v91_v14 = vsel %vm87_vm2, %v84_v11, -inf }
  0xe4   :  { %92 = vmax.xlane.f32.xlu0 %v91_v14 }
 0x16d   :  { %v90_v15 = vpop.xlane.xlu0 %89 }
 0x16e   :  { %v94_v16 = vsub.f32 %v81_v8, %v90_v15 }
 0x170   :  { %v96_v17 = vmul.f32 1.442695, %v94_v16 }
 0x171   :  { %v93_v18 = vpop.xlane.xlu0 %92 }
 0x172   :  { %150 = vpow2.f32 %v96_v17  ;;  %v95_v19 = vsub.f32 %v84_v11, %v93_v18 }
 0x174   :  { %v98_v20 = vmul.f32 1.442695, %v95_v19 }
 0x176   :  { %152 = vpow2.f32 %v98_v20 }
 0x17c   :  { %v151_v21 = vpop.eup %150 }
 0x17d   :  { %v100_v22 = vsel %vm87_vm2, %v151_v21, 0.0 }
 0x17e   :  { %101 = vadd.xlane.f32.xlu1 %v100_v22 }
 0x180   :  { %v153_v23 = vpop.eup %152 }
 0x181   :  { %v103_v24 = vsel %vm87_vm2, %v153_v23, 0.0 }
 0x182   :  { %104 = vadd.xlane.f32.xlu1 %v103_v24 }
 0x20b   :  { %v102_v25 = vpop.xlane.xlu1 %101 }
 0x20c   :  { %154 = vrcp.f32 %v102_v25 }
 0x20f   :  { %v105_v26 = vpop.xlane.xlu1 %104 }
 0x210   :  { %156 = vrcp.f32 %v105_v26 }
 0x216   :  { %v155_v27 = vpop.eup %154 }
 0x217   :  { %v107_v28 = vmul.f32 %v155_v27, %v151_v21 }
 0x219   :  { %110 = vst.msk [vmem:[#allocation2] sm:$0xff] %vm87_vm2, %v107_v28 }
 0x21a   :  { %v157_v29 = vpop.eup %156 }
 0x21b   :  { %v109_v30 = vmul.f32 %v157_v29, %v153_v23 }
 0x21d   :  { %111 = vst.msk [vmem:[#allocation2 + $0x8] sm:$0xff] %vm87_vm2, %v109_v30 }
 0x21e   :  { %169 = shalt.err (!%p166_p4)
}
 0x21f   :  { %s170_s24 = scalar_lea.hbm %s243_s3, 256 }
 0x220   :  { %p171_p5 = scmp.ne.s32.totalorder %s243_s3, %s170_s24  ;;  %p174_p6 = scmp.lt.u32.totalorder %s170_s24, %s243_s3 }
 0x222   :  { %p176_p7 = pnand %p174_p6, %p171_p5 }
 0x224   :  { %179 = shalt.err (!%p176_p7)
}
 0x225   :  { %s185_s29 = smov 128   ;;  %s186_s30 = smov 8  }
 0x226   :  { %123 = dma.vmem_to_hbm [thread:$0]  %s118_s1, 256, %s243_s3, [#allocation3], %s185_s29, %s185_s29, %s186_s30  }
 0x227   :  { %180 = dma.done.wait [#allocation3], 256  }
 0x228   :  { %181 = vsyncadd [#allocation3], 4294967040 }
 0x229   :  { %127 = vsyncpa [#allocation3], 1 }

// kernel: transformer_fwd.9
= control target key start
LH: loop header
LB: loop body
LE: loop exit
PB: predicated region body
PF: predicated region fallthrough
CT: control target
= control target key end

     0   :  { %s1126_s13 = smov 0   ;;  %s1128_s14 = smov 0   ;;  %s1250_s0 = inlined_call_operand.vmem [shape: f32[2,8,32], index: 0, kind: input, shape index: {}]   ;;  %s1251_s1 = inlined_call_operand.vmem [shape: f32[2,4,8,8], index: 1, kind: input, shape index: {}, may-alias: {1,2}]   ;;  %s1252_s2 = inlined_call_operand.vmem [shape: f32[2,4,8,8], index: 2, kind: input, shape index: {}, may-alias: {1,2}]   ;;  %s1253_s3 = inlined_call_operand.vmem [shape: f32[2,1,8], index: 3, kind: input, shape index: {}]   ;;  %s1254_s4 = inlined_call_operand.vmem [shape: bf16[8,8], index: 4, kind: input, shape index: {}]   ;;  %s1255_s5 = inlined_call_operand.vmem [shape: bf16[8,16], index: 5, kind: input, shape index: {}]   ;;  %s1256_s6 = inlined_call_operand.vmem [shape: bf16[4,8,32], index: 6, kind: input, shape index: {}]   ;;  %s1257_s7 = inlined_call_operand.vmem [shape: f32[1,32], index: 7, kind: input, shape index: {}]   ;;  %s1258_s8 = inlined_call_operand.vmem [shape: f32[1,32], index: 8, kind: input, shape index: {}]   ;;  %s1259_s9 = inlined_call_operand.vmem [shape: f32[1,32], index: 9, kind: input, shape index: {}]   ;;  %s1260_s10 = inlined_call_operand.vmem [shape: f32[2,8,32], index: 10, kind: output, shape index: {}]  }
   0x1   :  { %1264 = sst [smem:[#allocation8_spill]] %s1258_s8  ;;  %s1130_s15 = smov 0  }
   0x2   :  { %1265 = sst [smem:[#allocation9_spill]] %s1259_s9  ;;  %s1132_s16 = smov 0  }
   0x3   :  { %s1134_s17 = smov 0  }
   0x4 LB: > { %1266 = sst [smem:[#allocation3_spill]] %s1056_s15  ;;  %s29_s18 = sadd.s32 1, %s1056_s15  ;;  %s1064_s17 = sphi %s1134_s17, %s20_s17   ;;  %s1060_s16 = sphi %s1132_s16, %s1277_s16   ;;  %s1056_s15 = sphi %s1130_s15, %s1276_s15   ;;  %s1052_s14 = sphi %s1128_s14, %s1275_s14   ;;  %s1048_s13 = sphi %s1126_s13, %s1274_s13  }
   0x5   : > { %1267 = sst [smem:[#allocation4_spill]] %s1060_s16  ;;  %s32_s19 = sadd.s32 1, %s1060_s16 }
   0x6   : > { %1268 = sst [smem:[#allocation5_spill]] %s1064_s17  ;;  %p30_p0 = scmp.ge.s32.totalorder %s29_s18, 4 }
   0x7   : > { %p915_p1 = scmp.ge.s32.totalorder %s1064_s17, 1  ;;  %p370_p2 = scmp.lt.s32.totalorder %s1064_s17, 9 }
   0x8   : > { %s1279_s18 = smov (%p30_p0, %s29_s18), 0  ;;  %s1281_s19 = smov (!%p30_p0, %s32_s19), %s1060_s16 }
   0x9   : > { %1269 = sst [smem:[#allocation6_spill]] %s1279_s18  ;;  %p371_p3 = pnand %p915_p1, %p370_p2 }
   0xa   : > { %p34_p4 = scmp.ge.s32.totalorder %s1281_s19, 2  ;;  %p429_p5 = scmp.lt.s32.totalorder (!%p371_p3), %s1052_s14, 1 }
   0xb   : > { %374 = sbr.rel (%p371_p3) target bundleno = 1544 (0x608), region = 60  ;;  %p435_p6 = scmp.lt.s32.totalorder (!%p371_p3), %s1048_s13, 3 }
   0xc   : > { %s1283_s19 = smov (%p34_p4, %s1281_s19), 0  ;;  %p923_p7 = scmp.ne.s32.totalorder (!%p371_p3), %s1048_s13, 0 }
   0xd   : > { %1270 = sst [smem:[#allocation7_spill]] %s1283_s19 }
  0x12   : > { %s1285_s14 = smov (!%p429_p5, %s1052_s14), 1  ;;  %vm465_vm0 = vcmask (!%p923_p7), 261120   ;;  %v1066_v0 = vmov (!%p923_p7), 0.0  }
  0x13   : > { %s436_s20 = scalar_select %p435_p6, %s1048_s13, 3 }
  0x14   : > { %s916_s21 = sshll.u32 %s1285_s14, 3  ;;  %s917_s22 = sshll.u32 %s1285_s14, 2  ;;  %466 = vst.msk [vmem:[#allocation2] sm:$0xff] (!%p923_p7), %vm465_vm0, %v1066_v0 }
  0x15   : > { %s1167_s25 = scalar_lea.vmem %s1250_s0, %s916_s21  ;;  %s438_s26 = sadd.s32 %s917_s22, %s436_s20 }
  0x16   : > { %s918_s27 = sshll.u32 %s438_s26, 3  ;;  %s451_s30 = scalar_lea.vmem %s1253_s3, %s1285_s14 }
  0x17   : > { %s440_s19 = scalar_lea.vmem %s1251_s1, %s918_s27  ;;  %s448_s15 = scalar_lea.vmem %s1252_s2, %s918_s27 }
  0x18   : > { %s921_s17 = sshll.u32 %s436_s20, 2  ;;  %s1182_s23 = scalar_lea.vmem %s1260_s10, %s916_s21 }
  0x19   : > { %s1187_s26 = scalar_lea.vmem %s1256_s6, %s921_s17  ;;  %464 = sbr.rel (%p923_p7) target bundleno = 32 (0x20), region = 64 }
  0x20 PF: > { %vm477_vm1 = vcmask 1043456   ;;  %v521_v1 = vld [vmem:[%s1255_s5] sm:$0xf]  ;;  %v1067_v3 = vmov 0.0   ;;  %vm1068_vm2 = vmmov 0   ;;  %vm473_vm3 = vcmask 64512  }
  0x21   : > { %v470_v2 = vld [vmem:[%s448_s15] sm:$0xff]  ;;  %951 = vmatprep.subr.bf16.mxu1 %v1067_v3  ;;  %v526_v4 = vsel %vm477_vm1, %v521_v1, 0  ;;  %953 = vmatprep.mubr.msk.bf16.mxu1 %vm1068_vm2, %v1067_v3  ;;  %s1069_s15 = smov 120   ;;  %v618_v23 = vlaneseq  ;;  %v1070_v27 = vmov 0   ;;  %vm742_vm8 = vcmask 261120   ;;  %p929_p8 = scmp.ne.s32.totalorder %s1048_s13, 3 }
  0x22   : > { %v471_v5 = vpack.c.bf16 %v470_v2, %v470_v2  ;;  %v472_v6 = vld [vmem:[%s1254_s4] sm:$0xf]  ;;  %952 = vmatpush3.bf16.msra.mxu1 %v526_v4  ;;  %945 = vmatprep.subr.bf16.mxu0 %v1067_v3  ;;  %s1272_s29 = sld [smem:[#allocation9_spill]] (!%p929_p8) }
  0x23   : > { %v468_v7 = vld [vmem:[%s440_s19] sm:$0xff]  ;;  %v479_v8 = vsel %vm477_vm1, %v472_v6, 0  ;;  %947 = vmatprep.mubr.msk.bf16.mxu0 %vm1068_vm2, %v1067_v3  ;;  %963 = vmatprep.subr.bf16.mxu1 %v1067_v3  ;;  %v619_v25 = vshrl.u32 %v618_v23, 7  ;;  %v621_v29 = vand.u32 127, %v618_v23 }
  0x24   : > { %v469_v9 = vpack.c.bf16 %v468_v7, %v468_v7  ;;  %946 = vmatpush3.bf16.msra.mxu0 %v479_v8  ;;  %v616_v24 = vld [vmem:[%s451_s30] sm:$0x1] }
  0x25   : > { %957 = vmatprep.subr.bf16.mxu0 %v1067_v3  ;;  %954 = vmatmul.mubr.msk.bf16.vlgmr.msra.gmra.mrb[0].mxu1 %vm473_vm3, %v471_v5  ;;  %vm617_vm4 = vcmp.gt.f32.partialorder %v616_v24, 0.0  ;;  %v626_v26 = vsub.s32 0, %v619_v25  ;;  %vm622_vm5 = vcmp.ge.s32.totalorder %v619_v25, %v621_v29  ;;  %v694_v43 = vld [vmem:[%s1187_s26] sm:$0xf] }
  0x26   : > { %965 = vmatprep.mubr.msk.bf16.mxu1 %vm1068_vm2, %v1067_v3  ;;  %v623_v28 = vsel %vm617_vm4, 1, %v1070_v27  ;;  %v699_v44 = vsel %vm477_vm1, %v694_v43, 0  ;;  %v467_v54 = vld [vmem:[#allocation2] sm:$0xff] }
  0x27   : > { %948 = vmatmul.mubr.msk.bf16.vlgmr.msra.gmra.mrb[0].mxu0 %vm473_vm3, %v469_v9  ;;  %v627_v30 = vrot.slane %v623_v28, %v626_v26  ;;  %v930_v61 = vld [vmem:[%s1257_s7] ss:$0 sm:$0xff] (!%p929_p8) }
  0x28   : > { %959 = vmatprep.mubr.msk.bf16.mxu0 %vm1068_vm2, %v1067_v3  ;;  %v757_v62 = vld [vmem:[%s1167_s25] sm:$0xff] (!%p929_p8)  ;;  %s1271_s25 = sld [smem:[#allocation8_spill]] (!%p929_p8) }
  0x29   : > { %vm628_vm6 = vcmp.eq.s32.totalorder %v627_v30, 1 }
  0x2a   : > { %vm629_vm7 = vmand %vm628_vm6, %vm622_vm5 }
  0xf8   : > { %v562_v10 = vpop.f32.mrb[0].mxu1 }
  0xf9   : > { %v569_v11 = vpack.c.bf16 %v562_v10, %v562_v10  ;;  %v955_v12 = vpop.f32.mrb[1].mxu1 }
  0xfa   : > { %v515_v13 = vpop.f32.mrb[0].mxu0  ;;  %v565_v14 = vpop.f32.mrb[2].mxu1 }
  0xfb   : > { %v949_v15 = vpop.f32.mrb[1].mxu0  ;;  %v574_v16 = vsel %vm473_vm3, %v569_v11, 0  ;;  %645 = vrot.lane.b32.xlu1 %v569_v11, %s1069_s15  ;;  %v956_v17 = vpop.f32.mrb[3].mxu1  ;;  %v568_v20 = vpack.c.bf16 %v515_v13, %v515_v13  ;;  %v931_v11 = vld [vmem:[%s1271_s25] ss:$0 sm:$0xff] (!%p929_p8) }
  0xfc   : > { %v518_v18 = vpop.f32.mrb[2].mxu0  ;;  %958 = vmatpush3.bf16.xpose.msra.mxu0 %v574_v16  ;;  %v932_v13 = vld [vmem:[%s1272_s29] ss:$0 sm:$0xff] (!%p929_p8) }
  0xfd   : > { %v950_v19 = vpop.f32.mrb[3].mxu0  ;;  %969 = vmatprep.subr.bf16.mxu0 %v1067_v3 }
 0x103   : > { %960 = vmatmul.mubr.msk.bf16.vlgmr.msra.gmra.mrb[4].mxu0 %vm473_vm3, %v568_v20 }
 0x104   : > { %971 = vmatprep.mubr.msk.bf16.mxu0 %vm1068_vm2, %v1067_v3  ;;  %970 = vmatpush3.bf16.msra.mxu0 %v699_v44 }
 0x16d   : > { %v646_v21 = vpop.permute.xlu1 %645 }
 0x16e   : > { %v651_v22 = vsel %vm477_vm1, %v646_v21, 0 }
 0x16f   : > { %964 = vmatpush3.bf16.msra.mxu1 %v651_v22 }
 0x1d6   : > { %v610_v31 = vpop.f32.mrb[4].mxu0 }
 0x1d7   : > { %v630_v32 = vsel %vm629_vm7, %v610_v31, -1e+20  ;;  %v961_v33 = vpop.f32.mrb[5].mxu0 }
 0x1d8   : > { %v631_v34 = vmul.f32 0.17677669, %v630_v32  ;;  %v613_v35 = vpop.f32.mrb[6].mxu0 }
 0x1d9   : > { %v962_v36 = vpop.f32.mrb[7].mxu0 }
 0x1da   : > { %v632_v37 = vsel %vm473_vm3, %v631_v34, -inf }
 0x1db   : > { %633 = vmax.xlane.f32.xlu0 %v632_v37 }
 0x268   : > { %v634_v38 = vpop.xlane.xlu0 %633 }
 0x269   : > { %v635_v39 = vsub.f32 %v631_v34, %v634_v38 }
 0x26b   : > { %v636_v40 = vmul.f32 1.442695, %v635_v39 }
 0x26d   : > { %1020 = vpow2.f32 %v636_v40 }
 0x277   : > { %v1021_v41 = vpop.eup %1020 }
 0x278   : > { %v638_v42 = vsel %vm473_vm3, %v1021_v41, 0.0 }
 0x279   : > { %639 = vadd.xlane.f32.xlu0 %v638_v42 }
 0x306   : > { %v640_v45 = vpop.xlane.xlu0 %639 }
 0x307   : > { %1022 = vrcp.f32 %v640_v45 }
 0x311   : > { %v1023_v46 = vpop.eup %1022 }
 0x312   : > { %v642_v47 = vmul.f32 %v1023_v46, %v1021_v41 }
 0x314   : > { %v643_v48 = vpack.c.bf16 %v642_v47, %v642_v47 }
 0x316   : > { %966 = vmatmul.mubr.msk.bf16.vlgmr.msra.gmra.mrb[4].mxu1 %vm473_vm3, %v643_v48 }
 0x3e9   : > { %v687_v49 = vpop.f32.mrb[4].mxu1 }
 0x3ea   : > { %v693_v50 = vpack.c.bf16 %v687_v49, %v687_v49  ;;  %v967_v51 = vpop.f32.mrb[5].mxu1 }
 0x3eb   : > { %v690_v52 = vpop.f32.mrb[6].mxu1 }
 0x3ec   : > { %v968_v53 = vpop.f32.mrb[7].mxu1  ;;  %972 = vmatmul.mubr.msk.bf16.vlgmr.msra.gmra.mrb[8].mxu0 %vm473_vm3, %v693_v50 }
 0x4bc   : > { %747 = sbr.rel (%p929_p8) target bundleno = 1544 (0x608), region = 68 }
 0x4bf   : > { %v735_v55 = vpop.f32.mrb[8].mxu0 }
 0x4c0   : > { %v741_v56 = vadd.f32 %v735_v55, %v467_v54  ;;  %v973_v57 = vpop.f32.mrb[9].mxu0 }
 0x4c1   : > { %v738_v58 = vpop.f32.mrb[10].mxu0 }
 0x4c2   : > { %743 = vst.msk [vmem:[#allocation2] sm:$0xff] %vm742_vm8, %v741_v56  ;;  %v974_v59 = vpop.f32.mrb[11].mxu0 }
 0x4c9   : > { %v748_v60 = vld [vmem:[#allocation2] sm:$0xff] }
 0x4ca   : > { %v756_v63 = vadd.f32 %v930_v61, %v748_v60 }
 0x4cc   : > { %v758_v0 = vadd.f32 %v757_v62, %v756_v63 }
 0x4ce   : > { %v761_v1 = vsel %vm742_vm8, %v758_v0, 0.0 }
 0x4cf   : > { %762 = vadd.xlane.f32.xlu0 %v761_v1 }
 0x55c   : > { %v763_v2 = vpop.xlane.xlu0 %762 }
 0x55d   : > { %v765_v3 = vmul.f32 0.03125, %v763_v2 }
 0x55f   : > { %v766_v4 = vsub.f32 %v758_v0, %v765_v3 }
 0x561   : > { %v767_v5 = vmul.f32 %v766_v4, %v766_v4 }
 0x563   : > { %v768_v6 = vsel %vm742_vm8, %v767_v5, 0.0 }
 0x564   : > { %769 = vadd.xlane.f32.xlu0 %v768_v6 }
 0x5f1   : > { %v770_v7 = vpop.xlane.xlu0 %769 }
 0x5f2   : > { %v771_v8 = vmul.f32 0.03125, %v770_v7 }
 0x5f4   : > { %v772_v9 = vadd.f32 1e-05, %v771_v8 }
 0x5f6   : > { %1024 = vrsqrt.f32 %v772_v9 }
 0x600   : > { %v1025_v10 = vpop.eup %1024 }
 0x601   : > { %v774_v12 = vmul.f32 %v1025_v10, %v766_v4 }
 0x603   : > { %v781_v14 = vmul.f32 %v931_v11, %v774_v12 }
 0x605   : > { %v788_v15 = vadd.f32 %v932_v13, %v781_v14 }
 0x607   : > { %789 = vst.msk [vmem:[%s1182_s23] sm:$0xff] %vm742_vm8, %v788_v15 }
 0x608 PF: > { %s1273_s30 = sld [smem:[#allocation5_spill]]  ;;  %s1274_s13 = sld [smem:[#allocation3_spill]] }
 0x609   : > { %s1275_s14 = sld [smem:[#allocation4_spill]]  ;;  %s1276_s15 = sld [smem:[#allocation6_spill]] }
 0x60a   : > { %s1277_s16 = sld [smem:[#allocation7_spill]] }
 0x60e   : > { %s20_s17 = sadd.s32 1, %s1273_s30  }
 0x60f   : > { %p17_p9 = scmp.ge.s32.totalorder %s20_s17, 10  }
 0x611   :  { %19 = sbr.rel (!%p17_p9) target bundleno = 4 (0x4), region = 110 }

// kernel: transformer_fwd.7
= control target key start
LH: loop header
LB: loop body
LE: loop exit
PB: predicated region body
PF: predicated region fallthrough
CT: control target
= control target key end

     0   :  { %s1694_s21 = smov 0   ;;  %s1696_s22 = smov 0   ;;  %s1872_s0 = inlined_call_operand.vmem [shape: f32[2,12,32], index: 0, kind: input, shape index: {}]   ;;  %s1873_s1 = inlined_call_operand.vmem [shape: f32[2,4,12,8], index: 1, kind: input, shape index: {}, may-alias: {1,2}]   ;;  %s1874_s2 = inlined_call_operand.vmem [shape: f32[2,4,12,8], index: 2, kind: input, shape index: {}, may-alias: {1,2}]   ;;  %s1875_s3 = inlined_call_operand.vmem [shape: f32[2,1,12], index: 3, kind: input, shape index: {}]   ;;  %s1876_s4 = inlined_call_operand.vmem [shape: bf16[8,8], index: 4, kind: input, shape index: {}]   ;;  %s1877_s5 = inlined_call_operand.vmem [shape: bf16[8,16], index: 5, kind: input, shape index: {}]   ;;  %s1878_s6 = inlined_call_operand.vmem [shape: bf16[4,8,32], index: 6, kind: input, shape index: {}]   ;;  %s1879_s7 = inlined_call_operand.vmem [shape: f32[1,32], index: 7, kind: input, shape index: {}]   ;;  %s1880_s8 = inlined_call_operand.vmem [shape: f32[1,32], index: 8, kind: input, shape index: {}]   ;;  %s1881_s9 = inlined_call_operand.vmem [shape: f32[1,32], index: 9, kind: input, shape index: {}]   ;;  %s1882_s10 = inlined_call_operand.vmem [shape: bf16[32,128], index: 10, kind: input, shape index: {}]   ;;  %s1883_s11 = inlined_call_operand.vmem [shape: f32[1,128], index: 11, kind: input, shape index: {}]   ;;  %s1884_s12 = inlined_call_operand.vmem [shape: bf16[128,32], index: 12, kind: input, shape index: {}]   ;;  %s1885_s13 = inlined_call_operand.vmem [shape: f32[1,32], index: 13, kind: input, shape index: {}]   ;;  %s1886_s14 = inlined_call_operand.vmem [shape: f32[1,32], index: 14, kind: input, shape index: {}]   ;;  %s1887_s15 = inlined_call_operand.vmem [shape: f32[1,32], index: 15, kind: input, shape index: {}]   ;;  %s1888_s16 = inlined_call_operand.vmem [shape: f32[2,12,32], index: 16, kind: output, shape index: {}]  }
   0x1   :  { %1894 = sst [smem:[#allocation8_spill]] %s1872_s0  ;;  %s1698_s23 = smov 0  }
   0x2   :  { %1895 = sst [smem:[#allocation9_spill]] %s1880_s8  ;;  %s1700_s24 = smov 0  }
   0x3   :  { %1896 = sst [smem:[#allocation10_spill]] %s1881_s9  ;;  %s1702_s25 = smov 0  }
   0x4   :  { %1897 = sst [smem:[#allocation11_spill]] %s1882_s10 }
   0x5   :  { %1898 = sst [smem:[#allocation12_spill]] %s1883_s11 }
   0x6   :  { %1899 = sst [smem:[#allocation13_spill]] %s1884_s12 }
   0x7   :  { %1900 = sst [smem:[#allocation14_spill]] %s1885_s13 }
   0x8   :  { %1901 = sst [smem:[#allocation15_spill]] %s1886_s14 }
   0x9   :  { %1902 = sst [smem:[#allocation16_spill]] %s1887_s15 }
   0xa LB: > { %1903 = sst [smem:[#allocation3_spill]] %s1592_s23  ;;  %s35_s26 = sadd.s32 1, %s1592_s23  ;;  %s1600_s25 = sphi %s1702_s25, %s26_s25   ;;  %s1596_s24 = sphi %s1700_s24, %s1922_s24   ;;  %s1592_s23 = sphi %s1698_s23, %s1921_s23   ;;  %s1588_s22 = sphi %s1696_s22, %s1920_s22   ;;  %s1584_s21 = sphi %s1694_s21, %s1919_s21  }
   0xb   : > { %1904 = sst [smem:[#allocation4_spill]] %s1596_s24  ;;  %s38_s27 = sadd.s32 1, %s1596_s24 }
   0xc   : > { %1905 = sst [smem:[#allocation5_spill]] %s1600_s25  ;;  %p36_p0 = scmp.ge.s32.totalorder %s35_s26, 4 }
   0xd   : > { %p1368_p1 = scmp.ge.s32.totalorder %s1600_s25, 1  ;;  %p523_p2 = scmp.lt.s32.totalorder %s1600_s25, 9 }
   0xe   : > { %s1924_s26 = smov (%p36_p0, %s35_s26), 0  ;;  %s1926_s27 = smov (!%p36_p0, %s38_s27), %s1596_s24 }
   0xf   : > { %1906 = sst [smem:[#allocation6_spill]] %s1924_s26  ;;  %p524_p3 = pnand %p1368_p1, %p523_p2 }
  0x10   : > { %p40_p4 = scmp.ge.s32.totalorder %s1926_s27, 2  ;;  %p598_p5 = scmp.lt.s32.totalorder (!%p524_p3), %s1588_s22, 1 }
  0x11   : > { %527 = sbr.rel (%p524_p3) target bundleno = 2316 (0x90c), region = 84  ;;  %p605_p6 = scmp.lt.s32.totalorder (!%p524_p3), %s1584_s21, 3 }
  0x12   : > { %s1928_s27 = smov (%p40_p4, %s1926_s27), 0  ;;  %s1908_s18 = sld [smem:[#allocation8_spill]] (!%p524_p3) }
  0x13   : > { %1907 = sst [smem:[#allocation7_spill]] %s1928_s27  ;;  %p1380_p7 = scmp.ne.s32.totalorder (!%p524_p3), %s1584_s21, 0 }
  0x18   : > { %s1930_s22 = smov (!%p598_p5, %s1588_s22), 1  ;;  %vm638_vm0 = vcmask (!%p1380_p7), 261120   ;;  %vm640_vm1 = vcmask (!%p1380_p7), 257024   ;;  %v1602_v0 = vmov (!%p1380_p7), 0.0  }
  0x19   : > { %s606_s28 = scalar_select %p605_p6, %s1584_s21, 3 }
  0x1a   : > { %s1407_s29 = sshll.u32 %s1930_s22, 4  ;;  %s1372_s30 = sshll.u32 %s1930_s22, 3  ;;  %639 = vst.msk [vmem:[#allocation2] sm:$0xff] (!%p1380_p7), %vm638_vm0, %v1602_v0 }
  0x1b   : > { %s1735_s19 = scalar_lea.vmem %s1908_s18, %s1407_s29  ;;  %s1371_s20 = sshll.u32 %s606_s28, 1  ;;  %641 = vst.msk [vmem:[#allocation2 + $0x8] sm:$0xf] (!%p1380_p7), %vm640_vm1, %v1602_v0 }
  0x1c   : > { %s609_s27 = sadd.s32 %s1372_s30, %s1371_s20  ;;  %s623_s23 = scalar_lea.vmem %s1875_s3, %s1930_s22 }
  0x1d   : > { %s1373_s25 = sshll.u32 %s609_s27, 3  ;;  %s1377_s15 = sshll.u32 %s606_s28, 2 }
  0x1e   : > { %s611_s11 = scalar_lea.vmem %s1873_s1, %s1373_s25  ;;  %s620_s12 = scalar_lea.vmem %s1874_s2, %s1373_s25 }
  0x1f   : > { %s1750_s17 = scalar_lea.vmem %s1878_s6, %s1377_s15  ;;  %s1755_s24 = scalar_lea.vmem %s1888_s16, %s1407_s29 }
  0x20   : > { %637 = sbr.rel (%p1380_p7) target bundleno = 39 (0x27), region = 88 }
  0x27 PF: > { %vm655_vm2 = vcmask 1043456   ;;  %v700_v1 = vld [vmem:[%s1877_s5] sm:$0xf]  ;;  %v1603_v3 = vmov 0.0   ;;  %vm1604_vm3 = vmmov 0   ;;  %vm651_vm4 = vcmask 64512  }
  0x28   : > { %v647_v2 = vld [vmem:[%s620_s12] sm:$0xff]  ;;  %1437 = vmatprep.subr.bf16.mxu1 %v1603_v3  ;;  %v705_v4 = vsel %vm655_vm2, %v700_v1, 0  ;;  %1439 = vmatprep.mubr.msk.bf16.mxu1 %vm1604_vm3, %v1603_v3  ;;  %v648_v5 = vld [vmem:[%s620_s12 + $0x8] sm:$0xf]  ;;  %v800_v23 = vlaneseq  ;;  %v1605_v27 = vmov 0   ;;  %vm809_vm7 = vcmask 97280  }
  0x29   : > { %v650_v6 = vld [vmem:[%s1876_s4] sm:$0xf]  ;;  %1438 = vmatpush3.bf16.msra.mxu1 %v705_v4  ;;  %v649_v7 = vpack.c.bf16 %v648_v5, %v647_v2  ;;  %1431 = vmatprep.subr.bf16.mxu0 %v1603_v3  ;;  %v645_v10 = vld [vmem:[%s611_s11 + $0x8] sm:$0xf]  ;;  %vm813_vm8 = vcmask 93184   ;;  %s1606_s14 = smov 120  }
  0x2a   : > { %v657_v8 = vsel %vm655_vm2, %v650_v6, 0  ;;  %v644_v9 = vld [vmem:[%s611_s11] sm:$0xff]  ;;  %1433 = vmatprep.mubr.msk.bf16.mxu0 %vm1604_vm3, %v1603_v3  ;;  %1449 = vmatprep.subr.bf16.mxu1 %v1603_v3  ;;  %v801_v25 = vshrl.u32 %v800_v23, 7  ;;  %vm840_vm9 = vcmask 1045504   ;;  %vm936_vm10 = vcmask 261120   ;;  %p1386_p8 = scmp.ne.s32.totalorder %s1584_s21, 3 }
  0x2b   : > { %1432 = vmatpush3.bf16.msra.mxu0 %v657_v8  ;;  %v646_v11 = vpack.c.bf16 %v645_v10, %v644_v9  ;;  %v797_v24 = vld [vmem:[%s623_s23] sm:$0x1]  ;;  %v643_v4 = vld [vmem:[#allocation2 + $0x8] sm:$0xf]  ;;  %vm938_vm11 = vcmask 257024   ;;  %s1909_s25 = sld [smem:[#allocation11_spill]] (!%p1386_p8) }
  0x2c   : > { %1443 = vmatprep.subr.bf16.mxu0 %v1603_v3  ;;  %1440 = vmatmul.mubr.msk.bf16.vlgmr.msra.gmra.mrb[0].mxu1 %vm651_vm4, %v649_v7  ;;  %vm798_vm5 = vcmp.gt.f32.partialorder %v797_v24, 0.0  ;;  %v802_v26 = vsub.s32 0, %v801_v25  ;;  %v886_v52 = vld [vmem:[%s1750_s17] sm:$0xf]  ;;  %vm1608_vm12 = vmmov (!%p1386_p8), 0   ;;  %s1911_s20 = sld [smem:[#allocation13_spill]] (!%p1386_p8) }
  0x2d   : > { %1451 = vmatprep.mubr.msk.bf16.mxu1 %vm1604_vm3, %v1603_v3  ;;  %v799_v28 = vsel %vm798_vm5, 1, %v1605_v27  ;;  %v891_v53 = vsel %vm655_vm2, %v886_v52, 0  ;;  %v642_v2 = vld [vmem:[#allocation2] sm:$0xff]  ;;  %s1912_s22 = sld [smem:[#allocation9_spill]] (!%p1386_p8)  ;;  %s1914_s30 = sld [smem:[#allocation12_spill]] (!%p1386_p8) }
  0x2e   : > { %1434 = vmatmul.mubr.msk.bf16.vlgmr.msra.gmra.mrb[0].mxu0 %vm651_vm4, %v646_v11  ;;  %v803_v29 = vrot.slane %v799_v28, %v802_v26  ;;  %v944_v10 = vld [vmem:[%s1735_s19] sm:$0xff] (!%p1386_p8)  ;;  %s1915_s9 = sld [smem:[#allocation14_spill]] (!%p1386_p8)  ;;  %s1916_s11 = sld [smem:[#allocation15_spill]] (!%p1386_p8) }
  0x2f   : > { %1445 = vmatprep.mubr.msk.bf16.mxu0 %vm1604_vm3, %v1603_v3  ;;  %s1917_s15 = sld [smem:[#allocation16_spill]] (!%p1386_p8) }
  0x30   : > { %vm804_vm6 = vcmp.eq.s32.totalorder %v803_v29, 1 }
  0x31   : > { %s1910_s26 = smov (!%p1386_p8), %s1909_s25 }
  0xff   : > { %v741_v12 = vpop.f32.mrb[0].mxu1 }
 0x100   : > { %v1441_v13 = vpop.f32.mrb[1].mxu1 }
 0x101   : > { %v693_v14 = vpop.f32.mrb[0].mxu0  ;;  %v744_v15 = vpop.f32.mrb[2].mxu1 }
 0x102   : > { %v1435_v16 = vpop.f32.mrb[1].mxu0  ;;  %v749_v17 = vpack.c.bf16 %v744_v15, %v741_v12  ;;  %v1442_v18 = vpop.f32.mrb[3].mxu1  ;;  %v1387_v12 = vld [vmem:[%s1879_s7] ss:$0 sm:$0xff] (!%p1386_p8) }
 0x103   : > { %v696_v19 = vpop.f32.mrb[2].mxu0 }
 0x104   : > { %v748_v20 = vpack.c.bf16 %v696_v19, %v693_v14  ;;  %v1436_v21 = vpop.f32.mrb[3].mxu0  ;;  %v754_v22 = vsel %vm651_vm4, %v749_v17, 0  ;;  %v945_v14 = vld [vmem:[%s1735_s19 + $0x8] sm:$0xf] (!%p1386_p8) }
 0x105   : > { %1444 = vmatpush3.bf16.xpose.msra.mxu0 %v754_v22 }
 0x106   : > { %1455 = vmatprep.subr.bf16.mxu0 %v1603_v3 }
 0x10c   : > { %1446 = vmatmul.mubr.msk.bf16.vlgmr.msra.gmra.mrb[4].mxu0 %vm651_vm4, %v748_v20 }
 0x10d   : > { %1457 = vmatprep.mubr.msk.bf16.mxu0 %vm1604_vm3, %v1603_v3  ;;  %1456 = vmatpush3.bf16.msra.mxu0 %v891_v53 }
 0x1df   : > { %v790_v30 = vpop.f32.mrb[4].mxu0 }
 0x1e0   : > { %v805_v31 = vsel %vm804_vm6, %v790_v30, -1e+20  ;;  %v1447_v32 = vpop.f32.mrb[5].mxu0 }
 0x1e1   : > { %v807_v33 = vmul.f32 0.17677669, %v805_v31  ;;  %v793_v34 = vpop.f32.mrb[6].mxu0  ;;  %v1544_v31 = vld [vmem:[%s1909_s25] sm:$0xff] (!%p1386_p8)   ;;  %v1607_v32 = vmov (!%p1386_p8), 0.0   ;;  %s1913_s25 = sld [smem:[#allocation10_spill]] (!%p1386_p8) }
 0x1e2   : > { %v806_v35 = vsel %vm804_vm6, %v793_v34, -1e+20  ;;  %v1448_v36 = vpop.f32.mrb[7].mxu0  ;;  %1461 = vmatprep.subr.bf16.mxu0 (!%p1386_p8), %v1607_v32  ;;  %v1546_v34 = vld [vmem:[%s1911_s20] sm:$0xff] (!%p1386_p8)  }
 0x1e3   : > { %v808_v37 = vmul.f32 0.17677669, %v806_v35  ;;  %v810_v38 = vsel %vm809_vm7, %v807_v33, -inf  ;;  %v1547_v35 = vld [vmem:[%s1911_s20 + $0x8] sm:$0xff] (!%p1386_p8)   ;;  %v1548_v36 = vld [vmem:[%s1911_s20 + $0x10] sm:$0xff] (!%p1386_p8)  }
 0x1e4   : > { %811 = vmax.xlane.f32.xlu0 %v810_v38  ;;  %v1550_v38 = vld [vmem:[%s1911_s20 + $0x20] sm:$0xff] (!%p1386_p8)  }
 0x1e5   : > { %v814_v39 = vsel %vm813_vm8, %v808_v37, -inf }
 0x1e7   : > { %v1389_v52 = vld [vmem:[%s1913_s25] ss:$0 sm:$0xff] (!%p1386_p8) }
 0x1e8   : > { %815 = vmax.xlane.f32.xlu0 %v814_v39  ;;  %v1551_v39 = vld [vmem:[%s1911_s20 + $0x28] sm:$0xff] (!%p1386_p8)  }
 0x1fe   : > { %835 = vrot.lane.b32.xlu0 %v749_v17, %s1606_s14 }
 0x271   : > { %v812_v40 = vpop.xlane.xlu0 %811 }
 0x272   : > { %v817_v41 = vsub.f32 %v807_v33, %v812_v40  ;;  %v1545_v33 = vld [vmem:[%s1910_s26 + $0x8] sm:$0xff] (!%p1386_p8)  }
 0x274   : > { %v819_v42 = vmul.f32 1.442695, %v817_v41 }
 0x275   : > { %v816_v43 = vpop.xlane.xlu0 %815 }
 0x276   : > { %1536 = vpow2.f32 %v819_v42  ;;  %v818_v44 = vsub.f32 %v808_v37, %v816_v43  ;;  %v1549_v37 = vld [vmem:[%s1911_s20 + $0x18] sm:$0xff] (!%p1386_p8)  }
 0x278   : > { %v821_v45 = vmul.f32 1.442695, %v818_v44 }
 0x279   : > { %v836_v46 = vpop.permute.xlu0 %835 }
 0x27a   : > { %1538 = vpow2.f32 %v821_v45  ;;  %v842_v47 = vsel %vm840_vm9, %v836_v46, 0 }
 0x27b   : > { %1450 = vmatpush3.bf16.msra.mxu1 %v842_v47 }
 0x27c   : > { %1469 = vmatprep.subr.bf16.mxu1 (!%p1386_p8), %v1607_v32 }
 0x280   : > { %v1537_v48 = vpop.eup %1536 }
 0x281   : > { %v823_v49 = vsel %vm809_vm7, %v1537_v48, 0.0 }
 0x282   : > { %824 = vadd.xlane.f32.xlu1 %v823_v49 }
 0x284   : > { %v1539_v50 = vpop.eup %1538 }
 0x285   : > { %v826_v51 = vsel %vm813_vm8, %v1539_v50, 0.0 }
 0x286   : > { %827 = vadd.xlane.f32.xlu1 %v826_v51 }
 0x30f   : > { %v825_v54 = vpop.xlane.xlu1 %824 }
 0x310   : > { %1540 = vrcp.f32 %v825_v54 }
 0x313   : > { %v828_v55 = vpop.xlane.xlu1 %827 }
 0x314   : > { %1542 = vrcp.f32 %v828_v55 }
 0x31a   : > { %v1541_v56 = vpop.eup %1540 }
 0x31b   : > { %v831_v58 = vmul.f32 %v1541_v56, %v1537_v48  ;;  %v1388_v48 = vld [vmem:[%s1912_s22] ss:$0 sm:$0xff] (!%p1386_p8) }
 0x31e   : > { %v1543_v57 = vpop.eup %1542 }
 0x31f   : > { %v832_v59 = vmul.f32 %v1543_v57, %v1539_v50  ;;  %v1552_v57 = vld [vmem:[%s1911_s20 + $0x30] sm:$0xff] (!%p1386_p8)  }
 0x321   : > { %v833_v60 = vpack.c.bf16 %v832_v59, %v831_v58  ;;  %v1553_v58 = vld [vmem:[%s1911_s20 + $0x38] sm:$0xff] (!%p1386_p8)   ;;  %v1390_v59 = vld [vmem:[%s1914_s30] ss:$0 sm:$0xff] (!%p1386_p8) }
 0x323   : > { %1452 = vmatmul.mubr.msk.bf16.vlgmr.msra.gmra.mrb[4].mxu1 %vm809_vm7, %v833_v60 }
 0x324   : > { %1485 = vmatprep.mubr.msk.bf16.mxu1 (!%p1386_p8), %vm1608_vm12, %v1607_v32  ;;  %1470 = vmatpush3.bf16.msra.mxu1 (!%p1386_p8), %v1546_v34 }
 0x325   : > { %1471 = vmatprep.subr.bf16.mxu1 (!%p1386_p8), %v1607_v32 }
 0x328   : > { %1472 = vmatpush3.bf16.msra.mxu1 (!%p1386_p8), %v1547_v35 }
 0x329   : > { %1473 = vmatprep.subr.bf16.mxu1 (!%p1386_p8), %v1607_v32 }
 0x32c   : > { %1474 = vmatpush3.bf16.msra.mxu1 (!%p1386_p8), %v1548_v36  ;;  %v1404_v36 = vld [vmem:[%s1917_s15] ss:$0 sm:$0xff] (!%p1386_p8) }
 0x32d   : > { %1475 = vmatprep.subr.bf16.mxu1 (!%p1386_p8), %v1607_v32 }
 0x330   : > { %1476 = vmatpush3.bf16.msra.mxu1 (!%p1386_p8), %v1549_v37 }
 0x331   : > { %1477 = vmatprep.subr.bf16.mxu1 (!%p1386_p8), %v1607_v32 }
 0x334   : > { %1478 = vmatpush3.bf16.msra.mxu1 (!%p1386_p8), %v1550_v38 }
 0x335   : > { %1479 = vmatprep.subr.bf16.mxu1 (!%p1386_p8), %v1607_v32 }
 0x338   : > { %1480 = vmatpush3.bf16.msra.mxu1 (!%p1386_p8), %v1551_v39 }
 0x339   : > { %1481 = vmatprep.subr.bf16.mxu1 (!%p1386_p8), %v1607_v32 }
 0x33c   : > { %1482 = vmatpush3.bf16.msra.mxu1 (!%p1386_p8), %v1552_v57 }
 0x33d   : > { %1483 = vmatprep.subr.bf16.mxu1 (!%p1386_p8), %v1607_v32 }
 0x340   : > { %1484 = vmatpush3.bf16.msra.mxu1 (!%p1386_p8), %v1553_v58 }
 0x3f6   : > { %v878_v61 = vpop.f32.mrb[4].mxu1 }
 0x3f7   : > { %v1453_v62 = vpop.f32.mrb[5].mxu1 }
 0x3f8   : > { %v881_v63 = vpop.f32.mrb[6].mxu1 }
 0x3f9   : > { %v885_v0 = vpack.c.bf16 %v881_v63, %v878_v61  ;;  %v1454_v1 = vpop.f32.mrb[7].mxu1 }
 0x3fb   : > { %1458 = vmatmul.mubr.msk.bf16.vlgmr.msra.gmra.mrb[8].mxu0 %vm651_vm4, %v885_v0 }
 0x3fc   : > { %1465 = vmatprep.mubr.msk.bf16.mxu0 (!%p1386_p8), %vm1608_vm12, %v1607_v32  ;;  %1462 = vmatpush3.bf16.msra.mxu0 (!%p1386_p8), %v1544_v31 }
 0x3fd   : > { %1463 = vmatprep.subr.bf16.mxu0 (!%p1386_p8), %v1607_v32 }
 0x400   : > { %1464 = vmatpush3.bf16.msra.mxu0 (!%p1386_p8), %v1545_v33  ;;  %v1403_v33 = vld [vmem:[%s1916_s11] ss:$0 sm:$0xff] (!%p1386_p8) }
 0x4cd   : > { %943 = sbr.rel (%p1386_p8) target bundleno = 2316 (0x90c), region = 92 }
 0x4ce   : > { %v927_v3 = vpop.f32.mrb[8].mxu0 }
 0x4cf   : > { %v934_v5 = vadd.f32 %v927_v3, %v642_v2  ;;  %v1459_v6 = vpop.f32.mrb[9].mxu0 }
 0x4d0   : > { %v930_v7 = vpop.f32.mrb[10].mxu0 }
 0x4d1   : > { %937 = vst.msk [vmem:[#allocation2] sm:$0xff] %vm936_vm10, %v934_v5  ;;  %v935_v8 = vadd.f32 %v930_v7, %v643_v4  ;;  %v1460_v9 = vpop.f32.mrb[11].mxu0  ;;  %v1394_v5 = vld [vmem:[%s1915_s9] ss:$0 sm:$0xff] (!%p1386_p8) }
 0x4d3   : > { %939 = vst.msk [vmem:[#allocation2 + $0x8] sm:$0xf] %vm938_vm11, %v935_v8 }
 0x4d8   : > { %v946_v11 = vld [vmem:[#allocation2] sm:$0xff] }
 0x4d9   : > { %v955_v13 = vadd.f32 %v1387_v12, %v946_v11 }
 0x4da   : > { %v947_v15 = vld [vmem:[#allocation2 + $0x8] sm:$0xf] }
 0x4db   : > { %v956_v16 = vadd.f32 %v1387_v12, %v947_v15  ;;  %v957_v17 = vadd.f32 %v955_v13, %v944_v10 }
 0x4dd   : > { %v958_v18 = vadd.f32 %v956_v16, %v945_v14  ;;  %v961_v19 = vsel %vm936_vm10, %v957_v17, 0.0 }
 0x4de   : > { %962 = vadd.xlane.f32.xlu0 %v961_v19 }
 0x4df   : > { %v964_v20 = vsel %vm938_vm11, %v958_v18, 0.0 }
 0x4e2   : > { %965 = vadd.xlane.f32.xlu0 %v964_v20 }
 0x56b   : > { %v963_v21 = vpop.xlane.xlu0 %962 }
 0x56c   : > { %v968_v22 = vmul.f32 0.03125, %v963_v21 }
 0x56e   : > { %v970_v23 = vsub.f32 %v957_v17, %v968_v22 }
 0x56f   : > { %v966_v24 = vpop.xlane.xlu0 %965 }
 0x570   : > { %v969_v25 = vmul.f32 0.03125, %v966_v24  ;;  %v972_v26 = vmul.f32 %v970_v23, %v970_v23 }
 0x572   : > { %v971_v27 = vsub.f32 %v958_v18, %v969_v25  ;;  %v974_v28 = vsel %vm936_vm10, %v972_v26, 0.0 }
 0x573   : > { %975 = vadd.xlane.f32.xlu1 %v974_v28 }
 0x574   : > { %v973_v29 = vmul.f32 %v971_v27, %v971_v27 }
 0x576   : > { %v977_v30 = vsel %vm938_vm11, %v973_v29, 0.0 }
 0x577   : > { %978 = vadd.xlane.f32.xlu1 %v977_v30 }
 0x600   : > { %v976_v40 = vpop.xlane.xlu1 %975 }
 0x601   : > { %v980_v41 = vmul.f32 0.03125, %v976_v40 }
 0x603   : > { %v982_v42 = vadd.f32 1e-05, %v980_v41 }
 0x604   : > { %v979_v43 = vpop.xlane.xlu1 %978 }
 0x605   : > { %1554 = vrsqrt.f32 %v982_v42  ;;  %v981_v44 = vmul.f32 0.03125, %v979_v43 }
 0x607   : > { %v983_v45 = vadd.f32 1e-05, %v981_v44 }
 0x609   : > { %1556 = vrsqrt.f32 %v983_v45 }
 0x60f   : > { %v1555_v46 = vpop.eup %1554 }
 0x610   : > { %v986_v47 = vmul.f32 %v1555_v46, %v970_v23 }
 0x612   : > { %v994_v51 = vmul.f32 %v1388_v48, %v986_v47 }
 0x613   : > { %v1557_v49 = vpop.eup %1556 }
 0x614   : > { %v987_v50 = vmul.f32 %v1557_v49, %v971_v27  ;;  %v1002_v54 = vadd.f32 %v1389_v52, %v994_v51 }
 0x616   : > { %v995_v53 = vmul.f32 %v1388_v48, %v987_v50 }
 0x618   : > { %v1003_v55 = vadd.f32 %v1389_v52, %v995_v53 }
 0x61a   : > { %v1004_v56 = vpack.c.bf16 %v1003_v55, %v1002_v54 }
 0x61c   : > { %1466 = vmatmul.mubr.msk.bf16.vlgmr.msra.gmra.mrb[0].mxu0 %vm936_vm10, %v1004_v56 }
 0x6ef   : > { %v1065_v60 = vpop.f32.mrb[0].mxu0 }
 0x6f0   : > { %v1066_v61 = vadd.f32 %v1390_v59, %v1065_v60  ;;  %v1467_v62 = vpop.f32.mrb[1].mxu0 }
 0x6f1   : > { %v1068_v63 = vpop.f32.mrb[2].mxu0 }
 0x6f2   : > { %v1069_v0 = vadd.f32 %v1390_v59, %v1068_v63  ;;  %v1468_v1 = vpop.f32.mrb[3].mxu0  ;;  %v1072_v2 = vmax.f32 %v1066_v61, 0.0 }
 0x6f4   : > { %v1073_v3 = vmax.f32 %v1069_v0, 0.0 }
 0x6f6   : > { %v1074_v4 = vpack.c.bf16 %v1073_v3, %v1072_v2 }
 0x6f8   : > { %1486 = vmatmul.mubr.bf16.vlgmr.msra.gmra.mrb[0].mxu1 %v1074_v4 }
 0x7cb   : > { %v1180_v6 = vpop.f32.mrb[0].mxu1 }
 0x7cc   : > { %v1181_v7 = vadd.f32 %v1394_v5, %v1180_v6  ;;  %v1487_v8 = vpop.f32.mrb[1].mxu1 }
 0x7cd   : > { %v1183_v9 = vpop.f32.mrb[2].mxu1 }
 0x7ce   : > { %v1184_v10 = vadd.f32 %v1394_v5, %v1183_v9  ;;  %v1488_v11 = vpop.f32.mrb[3].mxu1  ;;  %v1187_v12 = vadd.f32 %v1181_v7, %v1002_v54 }
 0x7d0   : > { %v1191_v13 = vsel %vm936_vm10, %v1187_v12, 0.0  ;;  %v1188_v14 = vadd.f32 %v1184_v10, %v1003_v55 }
 0x7d1   : > { %1192 = vadd.xlane.f32.xlu0 %v1191_v13 }
 0x7d2   : > { %v1194_v15 = vsel %vm938_vm11, %v1188_v14, 0.0 }
 0x7d3   : > { %1195 = vadd.xlane.f32.xlu1 %v1194_v15 }
 0x85e   : > { %v1193_v16 = vpop.xlane.xlu0 %1192 }
 0x85f   : > { %v1197_v17 = vmul.f32 0.03125, %v1193_v16 }
 0x860   : > { %v1196_v18 = vpop.xlane.xlu1 %1195 }
 0x861   : > { %v1199_v19 = vsub.f32 %v1187_v12, %v1197_v17  ;;  %v1198_v20 = vmul.f32 0.03125, %v1196_v18 }
 0x863   : > { %v1200_v21 = vsub.f32 %v1188_v14, %v1198_v20  ;;  %v1201_v22 = vmul.f32 %v1199_v19, %v1199_v19 }
 0x865   : > { %v1203_v23 = vsel %vm936_vm10, %v1201_v22, 0.0  ;;  %v1202_v24 = vmul.f32 %v1200_v21, %v1200_v21 }
 0x866   : > { %1204 = vadd.xlane.f32.xlu0 %v1203_v23 }
 0x867   : > { %v1206_v25 = vsel %vm938_vm11, %v1202_v24, 0.0 }
 0x868   : > { %1207 = vadd.xlane.f32.xlu1 %v1206_v25 }
 0x8f3   : > { %v1205_v26 = vpop.xlane.xlu0 %1204 }
 0x8f4   : > { %v1209_v27 = vmul.f32 0.03125, %v1205_v26 }
 0x8f5   : > { %v1208_v28 = vpop.xlane.xlu1 %1207 }
 0x8f6   : > { %v1211_v29 = vadd.f32 1e-05, %v1209_v27  ;;  %v1210_v30 = vmul.f32 0.03125, %v1208_v28 }
 0x8f8   : > { %1558 = vrsqrt.f32 %v1211_v29  ;;  %v1212_v31 = vadd.f32 1e-05, %v1210_v30 }
 0x8fa   : > { %1560 = vrsqrt.f32 %v1212_v31 }
 0x902   : > { %v1559_v32 = vpop.eup %1558 }
 0x903   : > { %v1215_v34 = vmul.f32 %v1559_v32, %v1199_v19 }
 0x904   : > { %v1561_v35 = vpop.eup %1560 }
 0x905   : > { %v1223_v37 = vmul.f32 %v1403_v33, %v1215_v34  ;;  %v1216_v38 = vmul.f32 %v1561_v35, %v1200_v21 }
 0x907   : > { %v1231_v39 = vadd.f32 %v1404_v36, %v1223_v37  ;;  %v1224_v40 = vmul.f32 %v1403_v33, %v1216_v38 }
 0x909   : > { %1233 = vst.msk [vmem:[%s1755_s24] sm:$0xff] %vm936_vm10, %v1231_v39  ;;  %v1232_v41 = vadd.f32 %v1404_v36, %v1224_v40 }
 0x90b   : > { %1234 = vst.msk [vmem:[%s1755_s24 + $0x8] sm:$0xf] %vm938_vm11, %v1232_v41 }
 0x90c PF: > { %s1918_s22 = sld [smem:[#allocation5_spill]]  ;;  %s1919_s21 = sld [smem:[#allocation3_spill]] }
 0x90d   : > { %s1921_s23 = sld [smem:[#allocation6_spill]]  ;;  %s1922_s24 = sld [smem:[#allocation7_spill]] }
 0x912   : > { %s26_s25 = sadd.s32 1, %s1918_s22   ;;  %s1920_s22 = sld [smem:[#allocation4_spill]] }
 0x913   : > { %p23_p9 = scmp.ge.s32.totalorder %s26_s25, 10  }
 0x915   :  { %25 = sbr.rel (!%p23_p9) target bundleno = 10 (0xa), region = 134 }

// kernel: transformer_fwd.10
= control target key start
LH: loop header
LB: loop body
LE: loop exit
PB: predicated region body
PF: predicated region fallthrough
CT: control target
= control target key end

     0   :  { %s1604_s21 = smov 0   ;;  %s1606_s22 = smov 0   ;;  %s1781_s0 = inlined_call_operand.vmem [shape: f32[2,8,32], index: 0, kind: input, shape index: {}]   ;;  %s1782_s1 = inlined_call_operand.vmem [shape: f32[2,4,8,8], index: 1, kind: input, shape index: {}]   ;;  %s1783_s2 = inlined_call_operand.vmem [shape: f32[2,4,12,8], index: 2, kind: input, shape index: {}]   ;;  %s1784_s3 = inlined_call_operand.vmem [shape: f32[2,1,12], index: 3, kind: input, shape index: {}]   ;;  %s1785_s4 = inlined_call_operand.vmem [shape: bf16[8,8], index: 4, kind: input, shape index: {}]   ;;  %s1786_s5 = inlined_call_operand.vmem [shape: bf16[8,16], index: 5, kind: input, shape index: {}]   ;;  %s1787_s6 = inlined_call_operand.vmem [shape: bf16[4,8,32], index: 6, kind: input, shape index: {}]   ;;  %s1788_s7 = inlined_call_operand.vmem [shape: f32[1,32], index: 7, kind: input, shape index: {}]   ;;  %s1789_s8 = inlined_call_operand.vmem [shape: f32[1,32], index: 8, kind: input, shape index: {}]   ;;  %s1790_s9 = inlined_call_operand.vmem [shape: f32[1,32], index: 9, kind: input, shape index: {}]   ;;  %s1791_s10 = inlined_call_operand.vmem [shape: bf16[32,128], index: 10, kind: input, shape index: {}]   ;;  %s1792_s11 = inlined_call_operand.vmem [shape: f32[1,128], index: 11, kind: input, shape index: {}]   ;;  %s1793_s12 = inlined_call_operand.vmem [shape: bf16[128,32], index: 12, kind: input, shape index: {}]   ;;  %s1794_s13 = inlined_call_operand.vmem [shape: f32[1,32], index: 13, kind: input, shape index: {}]   ;;  %s1795_s14 = inlined_call_operand.vmem [shape: f32[1,32], index: 14, kind: input, shape index: {}]   ;;  %s1796_s15 = inlined_call_operand.vmem [shape: f32[1,32], index: 15, kind: input, shape index: {}]   ;;  %s1797_s16 = inlined_call_operand.vmem [shape: f32[2,8,32], index: 16, kind: output, shape index: {}]  }
   0x1   :  { %1803 = sst [smem:[#allocation8_spill]] %s1781_s0  ;;  %s1608_s23 = smov 0  }
   0x2   :  { %1804 = sst [smem:[#allocation9_spill]] %s1788_s7  ;;  %s1610_s24 = smov 0  }
   0x3   :  { %1805 = sst [smem:[#allocation10_spill]] %s1789_s8  ;;  %s1612_s25 = smov 0  }
   0x4   :  { %1806 = sst [smem:[#allocation11_spill]] %s1790_s9 }
   0x5   :  { %1807 = sst [smem:[#allocation12_spill]] %s1791_s10 }
   0x6   :  { %1808 = sst [smem:[#allocation13_spill]] %s1792_s11 }
   0x7   :  { %1809 = sst [smem:[#allocation14_spill]] %s1793_s12 }
   0x8   :  { %1810 = sst [smem:[#allocation15_spill]] %s1794_s13 }
   0x9   :  { %1811 = sst [smem:[#allocation16_spill]] %s1795_s14 }
   0xa   :  { %1812 = sst [smem:[#allocation17_spill]] %s1796_s15 }
   0xb LB: > { %1813 = sst [smem:[#allocation3_spill]] %s1502_s23  ;;  %s35_s26 = sadd.s32 1, %s1502_s23  ;;  %s1510_s25 = sphi %s1612_s25, %s26_s25   ;;  %s1506_s24 = sphi %s1610_s24, %s1833_s24   ;;  %s1502_s23 = sphi %s1608_s23, %s1832_s23   ;;  %s1498_s22 = sphi %s1606_s22, %s1831_s22   ;;  %s1494_s21 = sphi %s1604_s21, %s1830_s21  }
   0xc   : > { %1814 = sst [smem:[#allocation4_spill]] %s1506_s24  ;;  %s38_s27 = sadd.s32 1, %s1506_s24 }
   0xd   : > { %1815 = sst [smem:[#allocation5_spill]] %s1510_s25  ;;  %p36_p0 = scmp.ge.s32.totalorder %s35_s26, 4 }
   0xe   : > { %p1291_p1 = scmp.ge.s32.totalorder %s1510_s25, 1  ;;  %p521_p2 = scmp.lt.s32.totalorder %s1510_s25, 9 }
   0xf   : > { %s1835_s26 = smov (%p36_p0, %s35_s26), 0  ;;  %s1837_s27 = smov (!%p36_p0, %s38_s27), %s1506_s24 }
  0x10   : > { %1816 = sst [smem:[#allocation6_spill]] %s1835_s26  ;;  %p522_p3 = pnand %p1291_p1, %p521_p2 }
  0x11   : > { %p40_p4 = scmp.ge.s32.totalorder %s1837_s27, 2  ;;  %p593_p5 = scmp.lt.s32.totalorder (!%p522_p3), %s1498_s22, 1 }
  0x12   : > { %525 = sbr.rel (%p522_p3) target bundleno = 2304 (0x900), region = 84  ;;  %p599_p6 = scmp.lt.s32.totalorder (!%p522_p3), %s1494_s21, 3 }
  0x13   : > { %s1839_s27 = smov (%p40_p4, %s1837_s27), 0  ;;  %s1818_s18 = sld [smem:[#allocation8_spill]] (!%p522_p3) }
  0x14   : > { %1817 = sst [smem:[#allocation7_spill]] %s1839_s27  ;;  %p1300_p7 = scmp.ne.s32.totalorder (!%p522_p3), %s1494_s21, 0 }
  0x19   : > { %s1841_s22 = smov (!%p593_p5, %s1498_s22), 1  ;;  %vm630_vm0 = vcmask (!%p1300_p7), 261120   ;;  %v1512_v0 = vmov (!%p1300_p7), 0.0  }
  0x1a   : > { %s600_s28 = scalar_select %p599_p6, %s1494_s21, 3 }
  0x1b   : > { %s1641_s29 = sshll.u32 %s1841_s22, 3  ;;  %s1293_s30 = sshll.u32 %s1841_s22, 2  ;;  %631 = vst.msk [vmem:[#allocation2] sm:$0xff] (!%p1300_p7), %vm630_vm0, %v1512_v0 }
  0x1c   : > { %s596_s19 = scalar_lea.vmem %s1818_s18, %s1641_s29  ;;  %s602_s20 = sadd.s32 %s1293_s30, %s600_s28 }
  0x1d   : > { %s1294_s27 = sshll.u32 %s602_s20, 3  ;;  %s1295_s26 = sshll.u32 %s600_s28, 1 }
  0x1e   : > { %s604_s25 = scalar_lea.vmem %s1782_s1, %s1294_s27  ;;  %s611_s15 = sadd.s32 %s1295_s26, %s1641_s29 }
  0x1f   : > { %s1297_s14 = sshll.u32 %s611_s15, 3  ;;  %s616_s9 = scalar_lea.vmem %s1784_s3, %s1841_s22 }
  0x20   : > { %s613_s10 = scalar_lea.vmem %s1783_s2, %s1297_s14  ;;  %s1298_s7 = sshll.u32 %s600_s28, 2 }
  0x21   : > { %s1662_s30 = scalar_lea.vmem %s1787_s6, %s1298_s7  ;;  %s624_s23 = scalar_lea.vmem %s1797_s16, %s1641_s29 }
  0x22   : > { %629 = sbr.rel (%p1300_p7) target bundleno = 41 (0x29), region = 88 }
  0x29 PF: > { %vm643_vm1 = vcmask 1043456   ;;  %v687_v1 = vld [vmem:[%s1786_s5] sm:$0xf]  ;;  %v1513_v3 = vmov 0.0   ;;  %vm1514_vm2 = vmmov 0   ;;  %vm639_vm3 = vcmask 64512  }
  0x2a   : > { %v635_v2 = vld [vmem:[%s613_s10] sm:$0xff]  ;;  %1355 = vmatprep.subr.bf16.mxu1 %v1513_v3  ;;  %v692_v4 = vsel %vm643_vm1, %v687_v1, 0  ;;  %1357 = vmatprep.mubr.msk.bf16.mxu1 %vm1514_vm2, %v1513_v3  ;;  %v636_v5 = vld [vmem:[%s613_s10 + $0x8] sm:$0xf]  ;;  %s1515_s10 = smov 120   ;;  %vm812_vm4 = vcmask 1045504   ;;  %v786_v24 = vlaneseq }
  0x2b   : > { %v638_v6 = vld [vmem:[%s1785_s4] sm:$0xf]  ;;  %1356 = vmatpush3.bf16.msra.mxu1 %v692_v4  ;;  %v637_v7 = vpack.c.bf16 %v636_v5, %v635_v2  ;;  %1349 = vmatprep.subr.bf16.mxu0 %v1513_v3  ;;  %v1516_v28 = vmov 0   ;;  %vm793_vm7 = vcmask 97280   ;;  %vm905_vm8 = vcmask 261120   ;;  %p1306_p8 = scmp.ne.s32.totalorder %s1494_s21, 3 }
  0x2c   : > { %v645_v8 = vsel %vm643_vm1, %v638_v6, 0  ;;  %v633_v9 = vld [vmem:[%s604_s25] sm:$0xff]  ;;  %1351 = vmatprep.mubr.msk.bf16.mxu0 %vm1514_vm2, %v1513_v3  ;;  %1367 = vmatprep.subr.bf16.mxu1 %v1513_v3  ;;  %v787_v26 = vshrl.u32 %v786_v24, 7  ;;  %s1820_s26 = sld [smem:[#allocation9_spill]] (!%p1306_p8)  ;;  %s1821_s28 = sld [smem:[#allocation12_spill]] (!%p1306_p8)  ;;  %vm1518_vm9 = vmmov (!%p1306_p8), 0  }
  0x2d   : > { %1350 = vmatpush3.bf16.msra.mxu0 %v645_v8  ;;  %v634_v10 = vpack.c.bf16 %v633_v9, %v633_v9  ;;  %v783_v25 = vld [vmem:[%s616_s9] sm:$0x1]  ;;  %v1517_v8 = vmov (!%p1306_p8), 0.0   ;;  %s1822_s18 = sld [smem:[#allocation14_spill]] (!%p1306_p8)  ;;  %s1823_s25 = sld [smem:[#allocation10_spill]] (!%p1306_p8) }
  0x2e   : > { %1361 = vmatprep.subr.bf16.mxu0 %v1513_v3  ;;  %1358 = vmatmul.mubr.msk.bf16.vlgmr.msra.gmra.mrb[0].mxu1 %vm639_vm3, %v637_v7  ;;  %vm784_vm5 = vcmp.gt.f32.partialorder %v783_v25, 0.0  ;;  %v788_v27 = vsub.s32 0, %v787_v26  ;;  %v857_v43 = vld [vmem:[%s1662_s30] sm:$0xf]  ;;  %s1824_s27 = sld [smem:[#allocation11_spill]] (!%p1306_p8)  ;;  %s1825_s11 = sld [smem:[#allocation13_spill]] (!%p1306_p8) }
  0x2f   : > { %1369 = vmatprep.mubr.msk.bf16.mxu1 %vm1514_vm2, %v1513_v3  ;;  %v785_v29 = vsel %vm784_vm5, 1, %v1516_v28  ;;  %v862_v44 = vsel %vm643_vm1, %v857_v43, 0  ;;  %v632_v54 = vld [vmem:[#allocation2] sm:$0xff]  ;;  %s1827_s9 = sld [smem:[#allocation16_spill]] (!%p1306_p8)  ;;  %s1828_s24 = sld [smem:[#allocation17_spill]] (!%p1306_p8) }
  0x30   : > { %1352 = vmatmul.mubr.msk.bf16.vlgmr.msra.gmra.mrb[0].mxu0 %vm639_vm3, %v634_v10  ;;  %v789_v30 = vrot.slane %v785_v29, %v788_v27  ;;  %v911_v60 = vld [vmem:[%s596_s19] sm:$0xff] (!%p1306_p8) }
  0x31   : > { %1363 = vmatprep.mubr.msk.bf16.mxu0 %vm1514_vm2, %v1513_v3 }
  0x32   : > { %vm790_vm6 = vcmp.eq.s32.totalorder %v789_v30, 1  ;;  %v1307_v62 = vld [vmem:[%s1820_s26] ss:$0 sm:$0xff] (!%p1306_p8)  ;;  %v1459_v9 = vld [vmem:[%s1821_s28 + $0x8] sm:$0xff] (!%p1306_p8)  }
  0x33   : > { %v1458_v7 = vld [vmem:[%s1821_s28] sm:$0xff] (!%p1306_p8)   ;;  %v1466_v26 = vld [vmem:[%s1822_s18 + $0x30] sm:$0xff] (!%p1306_p8)   ;;  %v1467_v27 = vld [vmem:[%s1822_s18 + $0x38] sm:$0xff] (!%p1306_p8)  }
  0x34   : > { %v1460_v10 = vld [vmem:[%s1822_s18] sm:$0xff] (!%p1306_p8)  }
  0x35   : > { %v1310_v28 = vld [vmem:[%s1825_s11] ss:$0 sm:$0xff] (!%p1306_p8) }
 0x101   : > { %v728_v11 = vpop.f32.mrb[0].mxu1 }
 0x102   : > { %v1359_v12 = vpop.f32.mrb[1].mxu1 }
 0x103   : > { %v681_v13 = vpop.f32.mrb[0].mxu0  ;;  %v731_v14 = vpop.f32.mrb[2].mxu1  ;;  %v1462_v12 = vld [vmem:[%s1822_s18 + $0x10] sm:$0xff] (!%p1306_p8)  }
 0x104   : > { %v1353_v15 = vpop.f32.mrb[1].mxu0  ;;  %v736_v16 = vpack.c.bf16 %v731_v14, %v728_v11  ;;  %v1360_v17 = vpop.f32.mrb[3].mxu1  ;;  %v735_v21 = vpack.c.bf16 %v681_v13, %v681_v13  ;;  %v1461_v11 = vld [vmem:[%s1822_s18 + $0x8] sm:$0xff] (!%p1306_p8)   ;;  %v1463_v13 = vld [vmem:[%s1822_s18 + $0x18] sm:$0xff] (!%p1306_p8)   ;;  %v1464_v14 = vld [vmem:[%s1822_s18 + $0x20] sm:$0xff] (!%p1306_p8)  }
 0x105   : > { %v684_v18 = vpop.f32.mrb[2].mxu0  ;;  %v1465_v15 = vld [vmem:[%s1822_s18 + $0x28] sm:$0xff] (!%p1306_p8)  }
 0x106   : > { %v1354_v19 = vpop.f32.mrb[3].mxu0  ;;  %v741_v20 = vsel %vm639_vm3, %v736_v16, 0  ;;  %807 = vrot.lane.b32.xlu1 %v736_v16, %s1515_s10  ;;  %s1826_s10 = sld [smem:[#allocation15_spill]] (!%p1306_p8) }
 0x107   : > { %1362 = vmatpush3.bf16.xpose.msra.mxu0 %v741_v20  ;;  %v1308_v20 = vld [vmem:[%s1823_s25] ss:$0 sm:$0xff] (!%p1306_p8) }
 0x108   : > { %1373 = vmatprep.subr.bf16.mxu0 %v1513_v3 }
 0x10e   : > { %1364 = vmatmul.mubr.msk.bf16.vlgmr.msra.gmra.mrb[4].mxu0 %vm639_vm3, %v735_v21 }
 0x10f   : > { %1375 = vmatprep.mubr.msk.bf16.mxu0 %vm1514_vm2, %v1513_v3  ;;  %1374 = vmatpush3.bf16.msra.mxu0 %v862_v44 }
 0x110   : > { %1379 = vmatprep.subr.bf16.mxu0 (!%p1306_p8), %v1517_v8 }
 0x178   : > { %v808_v22 = vpop.permute.xlu1 %807 }
 0x179   : > { %v814_v23 = vsel %vm812_vm4, %v808_v22, 0  ;;  %v1309_v22 = vld [vmem:[%s1824_s27] ss:$0 sm:$0xff] (!%p1306_p8) }
 0x17a   : > { %1368 = vmatpush3.bf16.msra.mxu1 %v814_v23 }
 0x17b   : > { %1387 = vmatprep.subr.bf16.mxu1 (!%p1306_p8), %v1517_v8 }
 0x1e1   : > { %v777_v31 = vpop.f32.mrb[4].mxu0 }
 0x1e2   : > { %v791_v32 = vsel %vm790_vm6, %v777_v31, -1e+20  ;;  %v1365_v33 = vpop.f32.mrb[5].mxu0 }
 0x1e3   : > { %v792_v34 = vmul.f32 0.17677669, %v791_v32  ;;  %v780_v35 = vpop.f32.mrb[6].mxu0 }
 0x1e4   : > { %v1366_v36 = vpop.f32.mrb[7].mxu0 }
 0x1e5   : > { %v794_v37 = vsel %vm793_vm7, %v792_v34, -inf  ;;  %v1314_v36 = vld [vmem:[%s1826_s10] ss:$0 sm:$0xff] (!%p1306_p8) }
 0x1e6   : > { %795 = vmax.xlane.f32.xlu0 %v794_v37 }
 0x273   : > { %v796_v38 = vpop.xlane.xlu0 %795 }
 0x274   : > { %v797_v39 = vsub.f32 %v792_v34, %v796_v38 }
 0x276   : > { %v798_v40 = vmul.f32 1.442695, %v797_v39 }
 0x278   : > { %1454 = vpow2.f32 %v798_v40 }
 0x282   : > { %v1455_v41 = vpop.eup %1454 }
 0x283   : > { %v800_v42 = vsel %vm793_vm7, %v1455_v41, 0.0 }
 0x284   : > { %801 = vadd.xlane.f32.xlu0 %v800_v42 }
 0x311   : > { %v802_v45 = vpop.xlane.xlu0 %801 }
 0x312   : > { %1456 = vrcp.f32 %v802_v45 }
 0x31c   : > { %v1457_v46 = vpop.eup %1456 }
 0x31d   : > { %v804_v47 = vmul.f32 %v1457_v46, %v1455_v41 }
 0x31f   : > { %v805_v48 = vpack.c.bf16 %v804_v47, %v804_v47 }
 0x321   : > { %1370 = vmatmul.mubr.msk.bf16.vlgmr.msra.gmra.mrb[4].mxu1 %vm793_vm7, %v805_v48 }
 0x322   : > { %1403 = vmatprep.mubr.msk.bf16.mxu1 (!%p1306_p8), %vm1518_vm9, %v1517_v8  ;;  %1388 = vmatpush3.bf16.msra.mxu1 (!%p1306_p8), %v1460_v10 }
 0x323   : > { %1389 = vmatprep.subr.bf16.mxu1 (!%p1306_p8), %v1517_v8 }
 0x326   : > { %1390 = vmatpush3.bf16.msra.mxu1 (!%p1306_p8), %v1461_v11 }
 0x327   : > { %1391 = vmatprep.subr.bf16.mxu1 (!%p1306_p8), %v1517_v8 }
 0x32a   : > { %1392 = vmatpush3.bf16.msra.mxu1 (!%p1306_p8), %v1462_v12 }
 0x32b   : > { %1393 = vmatprep.subr.bf16.mxu1 (!%p1306_p8), %v1517_v8 }
 0x32e   : > { %1394 = vmatpush3.bf16.msra.mxu1 (!%p1306_p8), %v1463_v13 }
 0x32f   : > { %1395 = vmatprep.subr.bf16.mxu1 (!%p1306_p8), %v1517_v8 }
 0x332   : > { %1396 = vmatpush3.bf16.msra.mxu1 (!%p1306_p8), %v1464_v14 }
 0x333   : > { %1397 = vmatprep.subr.bf16.mxu1 (!%p1306_p8), %v1517_v8 }
 0x336   : > { %1398 = vmatpush3.bf16.msra.mxu1 (!%p1306_p8), %v1465_v15 }
 0x337   : > { %1399 = vmatprep.subr.bf16.mxu1 (!%p1306_p8), %v1517_v8 }
 0x33a   : > { %1400 = vmatpush3.bf16.msra.mxu1 (!%p1306_p8), %v1466_v26 }
 0x33b   : > { %1401 = vmatprep.subr.bf16.mxu1 (!%p1306_p8), %v1517_v8 }
 0x33e   : > { %1402 = vmatpush3.bf16.msra.mxu1 (!%p1306_p8), %v1467_v27 }
 0x3f4   : > { %v850_v49 = vpop.f32.mrb[4].mxu1 }
 0x3f5   : > { %v856_v50 = vpack.c.bf16 %v850_v49, %v850_v49  ;;  %v1371_v51 = vpop.f32.mrb[5].mxu1 }
 0x3f6   : > { %v853_v52 = vpop.f32.mrb[6].mxu1 }
 0x3f7   : > { %v1372_v53 = vpop.f32.mrb[7].mxu1  ;;  %1376 = vmatmul.mubr.msk.bf16.vlgmr.msra.gmra.mrb[8].mxu0 %vm639_vm3, %v856_v50 }
 0x3f8   : > { %1383 = vmatprep.mubr.msk.bf16.mxu0 (!%p1306_p8), %vm1518_vm9, %v1517_v8  ;;  %1380 = vmatpush3.bf16.msra.mxu0 (!%p1306_p8), %v1458_v7  ;;  %v1323_v53 = vld [vmem:[%s1827_s9] ss:$0 sm:$0xff] (!%p1306_p8) }
 0x3f9   : > { %1381 = vmatprep.subr.bf16.mxu0 (!%p1306_p8), %v1517_v8 }
 0x3fc   : > { %1382 = vmatpush3.bf16.msra.mxu0 (!%p1306_p8), %v1459_v9 }
 0x4c7   : > { %910 = sbr.rel (%p1306_p8) target bundleno = 2304 (0x900), region = 92 }
 0x4ca   : > { %v898_v55 = vpop.f32.mrb[8].mxu0 }
 0x4cb   : > { %v904_v56 = vadd.f32 %v898_v55, %v632_v54  ;;  %v1377_v57 = vpop.f32.mrb[9].mxu0  ;;  %v1324_v55 = vld [vmem:[%s1828_s24] ss:$0 sm:$0xff] (!%p1306_p8) }
 0x4cc   : > { %v901_v58 = vpop.f32.mrb[10].mxu0 }
 0x4cd   : > { %906 = vst.msk [vmem:[#allocation2] sm:$0xff] %vm905_vm8, %v904_v56  ;;  %v1378_v59 = vpop.f32.mrb[11].mxu0 }
 0x4d4   : > { %v912_v61 = vld [vmem:[#allocation2] sm:$0xff] }
 0x4d5   : > { %v920_v63 = vadd.f32 %v1307_v62, %v912_v61 }
 0x4d7   : > { %v921_v0 = vadd.f32 %v920_v63, %v911_v60 }
 0x4d9   : > { %v924_v1 = vsel %vm905_vm8, %v921_v0, 0.0 }
 0x4da   : > { %925 = vadd.xlane.f32.xlu0 %v924_v1 }
 0x567   : > { %v926_v2 = vpop.xlane.xlu0 %925 }
 0x568   : > { %v928_v3 = vmul.f32 0.03125, %v926_v2 }
 0x56a   : > { %v929_v4 = vsub.f32 %v921_v0, %v928_v3 }
 0x56c   : > { %v930_v5 = vmul.f32 %v929_v4, %v929_v4 }
 0x56e   : > { %v931_v6 = vsel %vm905_vm8, %v930_v5, 0.0 }
 0x56f   : > { %932 = vadd.xlane.f32.xlu0 %v931_v6 }
 0x5fc   : > { %v933_v16 = vpop.xlane.xlu0 %932 }
 0x5fd   : > { %v934_v17 = vmul.f32 0.03125, %v933_v16 }
 0x5ff   : > { %v935_v18 = vadd.f32 1e-05, %v934_v17 }
 0x601   : > { %1468 = vrsqrt.f32 %v935_v18 }
 0x60b   : > { %v1469_v19 = vpop.eup %1468 }
 0x60c   : > { %v937_v21 = vmul.f32 %v1469_v19, %v929_v4 }
 0x60e   : > { %v944_v23 = vmul.f32 %v1308_v20, %v937_v21 }
 0x610   : > { %v951_v24 = vadd.f32 %v1309_v22, %v944_v23 }
 0x612   : > { %v952_v25 = vpack.c.bf16 %v951_v24, %v951_v24 }
 0x614   : > { %1384 = vmatmul.mubr.msk.bf16.vlgmr.msra.gmra.mrb[0].mxu0 %vm905_vm8, %v952_v25 }
 0x6e7   : > { %v1013_v29 = vpop.f32.mrb[0].mxu0 }
 0x6e8   : > { %v1014_v30 = vadd.f32 %v1310_v28, %v1013_v29  ;;  %v1385_v31 = vpop.f32.mrb[1].mxu0 }
 0x6e9   : > { %v1016_v32 = vpop.f32.mrb[2].mxu0 }
 0x6ea   : > { %v1019_v33 = vmax.f32 %v1014_v30, 0.0  ;;  %v1386_v34 = vpop.f32.mrb[3].mxu0 }
 0x6ec   : > { %v1020_v35 = vpack.c.bf16 %v1019_v33, %v1019_v33 }
 0x6ee   : > { %1404 = vmatmul.mubr.bf16.vlgmr.msra.gmra.mrb[0].mxu1 %v1020_v35 }
 0x7c1   : > { %v1126_v37 = vpop.f32.mrb[0].mxu1 }
 0x7c2   : > { %v1127_v38 = vadd.f32 %v1314_v36, %v1126_v37  ;;  %v1405_v39 = vpop.f32.mrb[1].mxu1 }
 0x7c3   : > { %v1129_v40 = vpop.f32.mrb[2].mxu1 }
 0x7c4   : > { %v1406_v41 = vpop.f32.mrb[3].mxu1  ;;  %v1132_v42 = vadd.f32 %v1127_v38, %v951_v24 }
 0x7c6   : > { %v1135_v43 = vsel %vm905_vm8, %v1132_v42, 0.0 }
 0x7c7   : > { %1136 = vadd.xlane.f32.xlu1 %v1135_v43 }
 0x854   : > { %v1137_v44 = vpop.xlane.xlu1 %1136 }
 0x855   : > { %v1138_v45 = vmul.f32 0.03125, %v1137_v44 }
 0x857   : > { %v1139_v46 = vsub.f32 %v1132_v42, %v1138_v45 }
 0x859   : > { %v1140_v47 = vmul.f32 %v1139_v46, %v1139_v46 }
 0x85b   : > { %v1141_v48 = vsel %vm905_vm8, %v1140_v47, 0.0 }
 0x85c   : > { %1142 = vadd.xlane.f32.xlu1 %v1141_v48 }
 0x8e9   : > { %v1143_v49 = vpop.xlane.xlu1 %1142 }
 0x8ea   : > { %v1144_v50 = vmul.f32 0.03125, %v1143_v49 }
 0x8ec   : > { %v1145_v51 = vadd.f32 1e-05, %v1144_v50 }
 0x8ee   : > { %1470 = vrsqrt.f32 %v1145_v51 }
 0x8f8   : > { %v1471_v52 = vpop.eup %1470 }
 0x8f9   : > { %v1147_v54 = vmul.f32 %v1471_v52, %v1139_v46 }
 0x8fb   : > { %v1154_v56 = vmul.f32 %v1323_v53, %v1147_v54 }
 0x8fd   : > { %v1161_v57 = vadd.f32 %v1324_v55, %v1154_v56 }
 0x8ff   : > { %1162 = vst.msk [vmem:[%s624_s23] sm:$0xff] %vm905_vm8, %v1161_v57 }
 0x900 PF: > { %s1829_s21 = sld [smem:[#allocation5_spill]]  ;;  %s1831_s22 = sld [smem:[#allocation4_spill]] }
 0x901   : > { %s1832_s23 = sld [smem:[#allocation6_spill]]  ;;  %s1833_s24 = sld [smem:[#allocation7_spill]] }
 0x906   : > { %s26_s25 = sadd.s32 1, %s1829_s21   ;;  %s1830_s21 = sld [smem:[#allocation3_spill]] }
 0x907   : > { %p23_p9 = scmp.ge.s32.totalorder %s26_s25, 10  }
 0x909   :  { %25 = sbr.rel (!%p23_p9) target bundleno = 11 (0xb), region = 134 }

</bundles_post_ra>
